<compile_context>
chip_gen: v7x
topology: tpu7x:2x2x1
jax: 0.10.0
libtpu: 0.0.40
codegen_flags: <defaults>
</compile_context>

<pallas_src>
import functools

import numpy as np

import jax
import jax.numpy as jnp
from jax.experimental import pallas as pl
from jax.experimental.pallas import tpu as pltpu


def _maxpool3d_2x_kernel(x_ref, tgt_ref, o_ref, *, g, HW, W, cdtype):
    """One row-block of the 2x2x2 / stride-2 max pool.

    x_ref:   (bt, g*2*HW)  rows = (n, c, depth-out block); lanes = (dg, kd, h, w)
    tgt_ref: (1, g*P)      int32 source-lane index for each output lane (dg, ho, wo)
    o_ref:   (bt, g*P)     rows as above;                  lanes = (dg, ho, wo)
    """
    L = g * HW
    x = x_ref[...].astype(cdtype)

    # Depth-pair (kd) max: 128-aligned static lane slices, pure VPU.
    parts = []
    for dg in range(g):
        base = dg * 2 * HW
        parts.append(jnp.maximum(x[:, base:base + HW], x[:, base + HW:base + 2 * HW]))
    y = parts[0] if g == 1 else jnp.concatenate(parts, axis=-1)          # (bt, g*HW)

    # 2x2 H/W window max: neighbor at lane +1 (kw) and +W (kh) via XLU rolls
    # (shift L-1 == -1 and L-W == -W under jnp.roll semantics).  Only even (h, w)
    # lanes are consumed below, so the circular wrap never contaminates a result.
    y = jnp.maximum(y, pltpu.roll(y, L - 1, axis=1))
    y = jnp.maximum(y, pltpu.roll(y, L - W, axis=1))
    # Lane dg*HW + (2*ho)*W + 2*wo now holds the full 2x2x2 window max.

    # Stride-2 lane compaction: one 0/1 block-diagonal selection matmul on the MXU.
    # The matrix is generated in-kernel (iota vs. tiny lane-target vector), no HBM stream.
    rows_i = jax.lax.broadcasted_iota(jnp.int32, (L, o_ref.shape[-1]), 0)
    sel = jnp.where(rows_i == tgt_ref[...], 1.0, 0.0).astype(cdtype)     # (g*HW, g*P)

    out = jnp.dot(y, sel, preferred_element_type=jnp.float32,
                  precision=jax.lax.Precision.HIGHEST)                   # exact selection
    o_ref[...] = out.astype(o_ref.dtype)


@jax.jit
def single_down_forward(x):
    """SingleDown.forward == nn.MaxPool3d(2).  x: (N, C, D, H, W) -> (N, C, D//2, H//2, W//2)."""
    N, C, D, H, W = x.shape
    Do, Ho, Wo = D // 2, H // 2, W // 2
    if (D % 2) or (H % 2) or (W % 2):
        # PyTorch floor mode: trailing odd planes / rows / cols are dropped.
        x = x[:, :, :2 * Do, :2 * Ho, :2 * Wo]
    He, We = 2 * Ho, 2 * Wo
    HW, P = He * We, Ho * Wo

    # Pack g consecutive depth-outputs per row so the output block is >= 128 lanes wide.
    g = 1
    while P > 0 and g * P < 128 and 2 * g <= Do and Do % (2 * g) == 0:
        g *= 2

    rows = N * C * (Do // g)
    lanes_in = g * 2 * HW
    xr = x.reshape(rows, lanes_in)          # free contiguous reshape: lanes = (dg, kd, h, w)

    # Row-block size: multiple of 8 sublanes, ~<=2 MiB of input per step, and enough grid
    # steps to pipeline the HBM DMA and shard the "parallel" axis across both v7x cores.
    row_bytes = lanes_in * xr.dtype.itemsize
    max_steps = max(1, rows // 8)
    steps_by_bytes = -(-(rows * row_bytes) // (2 * 1024 * 1024))
    steps = min(max(steps_by_bytes, 4), max_steps)
    bt = -(-rows // steps)
    bt = -(-bt // 8) * 8
    grid_n = -(-rows // bt)
    rows_pad = grid_n * bt
    if rows_pad != rows:
        xr = jnp.pad(xr, ((0, rows_pad - rows), (0, 0)))

    # Keep bf16 in bf16 end-to-end; everything else computes in f32.
    if x.dtype in (jnp.dtype(jnp.bfloat16), jnp.dtype(jnp.float32)):
        cdtype = x.dtype
    else:
        cdtype = jnp.float32

    # Per-output-lane source lane: column (dg, ho, wo) <- lane dg*HW + (2*ho)*W + 2*wo.
    c = np.arange(g * P, dtype=np.int64)
    dgc, p = c // P, c % P
    ho, wo = p // Wo, p % Wo
    tgt = jnp.asarray((dgc * HW + 2 * ho * We + 2 * wo).astype(np.int32).reshape(1, g * P))

    kernel = functools.partial(_maxpool3d_2x_kernel, g=g, HW=HW, W=We, cdtype=cdtype)
    out = pl.pallas_call(
        kernel,
        out_shape=jax.ShapeDtypeStruct((rows_pad, g * P), x.dtype),
        grid=(grid_n,),
        in_specs=[
            pl.BlockSpec((bt, lanes_in), lambda i: (i, 0)),
            pl.BlockSpec((1, g * P), lambda i: (0, 0)),   # constant index -> DMA'd once
        ],
        out_specs=pl.BlockSpec((bt, g * P), lambda i: (i, 0)),
        compiler_params=pltpu.CompilerParams(
            dimension_semantics=("parallel",),
            vmem_limit_bytes=32 * 1024 * 1024,
        ),
    )(xr, tgt)

    if rows_pad != rows:
        out = out[:rows]
    # Rows enumerate (n, c, do_block); columns enumerate (dg, ho, wo) -> contiguous reshape.
    return out.reshape(N, C, Do, Ho, Wo)


# ---------------------------------------------------------------------------
# Pure-JAX reference for the correctness check.
# ---------------------------------------------------------------------------
def _ref_maxpool3d_2(x):
    N, C, D, H, W = x.shape
    Do, Ho, Wo = D // 2, H // 2, W // 2
    xc = x[:, :, :2 * Do, :2 * Ho, :2 * Wo]
    return xc.reshape(N, C, Do, 2, Ho, 2, Wo, 2).max(axis=(3, 5, 7))


if __name__ == "__main__":
    key = jax.random.PRNGKey(0)
    N, C, D, H, W = 2, 4, 16, 16, 16
    x = jax.random.normal(key, (N, C, D, H, W), jnp.float32)   # NCDHW, like PyTorch

    out = jax.block_until_ready(single_down_forward(x))
    assert out.shape == (N, C, D // 2, H // 2, W // 2), out.shape

    ref = jax.block_until_ready(_ref_maxpool3d_2(x))
    assert jnp.allclose(out, ref, atol=1e-4, rtol=1e-4), (
        float(jnp.max(jnp.abs(out - ref))))

    print("KERNEL_OK")
</pallas_src>

<mosaic_0001>
module attributes {stable_mosaic.version = 11 : i64} {
  func.func @_maxpool3d_2x_kernel(%arg0: i32, %arg1: memref<8x1024xf32, #tpu.memory_space<vmem>>, %arg2: memref<1x128xi32, #tpu.memory_space<vmem>>, %arg3: memref<8x128xf32, #tpu.memory_space<vmem>>) attributes {dimension_semantics = [#tpu.dimension_semantics<parallel>], iteration_bounds = array<i64: 4>, scalar_prefetch = 0 : i64, scratch_operands = 0 : i64, tpu.core_type = #tpu.core_type<tc>, window_params = [{transform_indices = @transform_0, window_bounds = array<i64: 8, 1024>}, {pipeline_mode = #tpu.pipeline_mode<synchronous>, transform_indices = @transform_1, window_bounds = array<i64: 1, 128>}, {transform_indices = @transform_2, window_bounds = array<i64: 8, 128>}]} {
    %c0 = arith.constant 0 : index
    %c0_0 = arith.constant 0 : index
    %0 = vector.load %arg1[%c0, %c0_0] : memref<8x1024xf32, #tpu.memory_space<vmem>>, vector<8x1024xf32>
    %1 = vector.extract_strided_slice %0 {offsets = [0, 0], sizes = [8, 256], strides = [1, 1]} : vector<8x1024xf32> to vector<8x256xf32>
    %2 = vector.extract_strided_slice %0 {offsets = [0, 256], sizes = [8, 256], strides = [1, 1]} : vector<8x1024xf32> to vector<8x256xf32>
    %3 = arith.maximumf %1, %2 : vector<8x256xf32>
    %4 = vector.extract_strided_slice %0 {offsets = [0, 512], sizes = [8, 256], strides = [1, 1]} : vector<8x1024xf32> to vector<8x256xf32>
    %5 = vector.extract_strided_slice %0 {offsets = [0, 768], sizes = [8, 256], strides = [1, 1]} : vector<8x1024xf32> to vector<8x256xf32>
    %6 = arith.maximumf %4, %5 : vector<8x256xf32>
    %7 = tpu.concatenate %3, %6 in 1 : vector<8x256xf32>, vector<8x256xf32> -> vector<8x512xf32>
    %c511_i32 = arith.constant 511 : i32
    %8 = tpu.dynamic_rotate %7 by %c511_i32 dim 1 : vector<8x512xf32>, i32 -> vector<8x512xf32>
    %9 = arith.maximumf %7, %8 : vector<8x512xf32>
    %c496_i32 = arith.constant 496 : i32
    %10 = tpu.dynamic_rotate %9 by %c496_i32 dim 1 : vector<8x512xf32>, i32 -> vector<8x512xf32>
    %11 = arith.maximumf %9, %10 : vector<8x512xf32>
    %12 = tpu.iota {dimensions = array<i32: 0>} : vector<512x128xi32>
    %c0_1 = arith.constant 0 : index
    %c0_2 = arith.constant 0 : index
    %13 = vector.load %arg2[%c0_1, %c0_2] : memref<1x128xi32, #tpu.memory_space<vmem>>, vector<1x128xi32>
    %14 = vector.broadcast %13 : vector<1x128xi32> to vector<512x128xi32>
    %15 = arith.cmpi eq, %12, %14 : vector<512x128xi32>
    %cst = arith.constant 1.000000e+00 : f32
    %cst_3 = arith.constant 0.000000e+00 : f32
    %16 = vector.broadcast %cst : f32 to vector<512x128xf32>
    %17 = vector.broadcast %cst_3 : f32 to vector<512x128xf32>
    %18 = arith.select %15, %16, %17 : vector<512x128xi1>, vector<512x128xf32>
    %cst_4 = arith.constant dense<0.000000e+00> : vector<8x128xf32>
    %19 = tpu.matmul %11, %18, %cst_4 {dimension_numbers = #tpu.dot_dimension_numbers<[1], [0], [0], [1], [0, 0, 1, 1], [], []>, precision = #tpu.contract_precision<fp32>} : vector<8x512xf32>, vector<512x128xf32>, vector<8x128xf32> -> vector<8x128xf32>
    %c0_5 = arith.constant 0 : index
    %c0_6 = arith.constant 0 : index
    %20 = vector.load %arg3[%c0_5, %c0_6] : memref<8x128xf32, #tpu.memory_space<vmem>>, vector<8x128xf32>
    tpu.vector_store %arg3[%c0_5, %c0_6], %19 {strides = array<i32>} : memref<8x128xf32, #tpu.memory_space<vmem>>, vector<8x128xf32>,
    return
  }
  func.func @transform_0(%arg0: i32) -> (i32, i32) {
    %c0_i32 = arith.constant 0 : i32
    %c0_i32_0 = arith.constant 0 : i32
    return %arg0, %c0_i32 : i32, i32
  }
  func.func @transform_1(%arg0: i32) -> (i32, i32) {
    %c0_i32 = arith.constant 0 : i32
    %c0_i32_0 = arith.constant 0 : i32
    %c0_i32_1 = arith.constant 0 : i32
    return %c0_i32, %c0_i32_0 : i32, i32
  }
  func.func @transform_2(%arg0: i32) -> (i32, i32) {
    %c0_i32 = arith.constant 0 : i32
    %c0_i32_0 = arith.constant 0 : i32
    return %arg0, %c0_i32 : i32, i32
  }
}

</mosaic_0001>

<bundles_post_ra>
// kernel: single_down_forward.1
= control target key start
LH: loop header
LB: loop body
LE: loop exit
PB: predicated region body
PF: predicated region fallthrough
CT: control target
= control target key end

     0   :  { %s2830_s9 = smov 0   ;;  %s4675_s0 = inlined_call_operand.vmem [shape: f32[32,1024], index: 0, kind: input, shape index: {}]   ;;  %s4676_s1 = inlined_call_operand.vmem [shape: s32[1,128], index: 1, kind: input, shape index: {}]   ;;  %s4677_s2 = inlined_call_operand.vmem [shape: f32[32,128], index: 2, kind: output, shape index: {}]  }
   0x1 LB: > { %s1782_s10 = sadd.s32 4294967295, %s2809_s9   ;;  %p1786_p0 = scmp.ge.s32.totalorder %s2809_s9, 1  ;;  %s2809_s9 = sphi %s2830_s9, %s12_s9  }
   0x2   : > { %p112_p1 = scmp.lt.s32.totalorder %s2809_s9, 5 }
   0x4   : > { %p113_p2 = pnand %p1786_p0, %p112_p1 }
   0x6   : > { %116 = sbr.rel (%p113_p2) target bundleno = 657 (0x291), region = 28 }
   0xd   : > { %p133_p3 = scmp.lt.s32.totalorder %s1782_s10, 3  ;;  %v4706_v0 = vlaneseq  ;;  %v2858_v15 = vld [vmem:[%s4676_s1] ss:$0 sm:$0xff]  ;;  %s2811_s17 = smov 127   ;;  %v4711_v18 = vmov 0.0   ;;  %v4871_v52 = vmov 0 }
   0xe   : > { %s2814_s18 = smov 112  }
   0xf   : > { %s5254_s10 = smov (!%p133_p3, %s1782_s10), 3  ;;  %v2842_v1 = vshrl.u32 %v4706_v0, 7 }
  0x10   : > { %s1985_s11 = sshll.u32 %s5254_s10, 6  ;;  %s1789_s21 = sshll.u32 %s5254_s10, 3 }
  0x11   : > { %s137_s14 = scalar_lea.vmem %s4675_s0, %s1985_s11  ;;  %v207_v13 = vadd.s32 128, %v2842_v1  ;;  %v208_v14 = vadd.s32 136, %v2842_v1  ;;  %v192_v17 = vadd.s32 8, %v2842_v1  ;;  %vm260_vm0 = vcmp.eq.s32.totalorder %v2842_v1, %v2858_v15  ;;  %s141_s24 = scalar_lea.vmem %s4677_s2, %s1789_s21 }
  0x12   : > { %v147_v2 = vld [vmem:[%s137_s14 + $0x28] sm:$0xff]  ;;  %v149_v3 = vld [vmem:[%s137_s14 + $0x38] sm:$0xff]  ;;  %v146_v7 = vld [vmem:[%s137_s14 + $0x20] sm:$0xff]  ;;  %v324_v19 = vsel %vm260_vm0, 1.0, %v4711_v18  ;;  %v209_v20 = vadd.s32 144, %v2842_v1  ;;  %v210_v27 = vadd.s32 152, %v2842_v1 }
  0x13   : > { %v143_v4 = vld [vmem:[%s137_s14 + $0x8] sm:$0xff]  ;;  %v2847_v5 = vmax.f32 %v147_v2, %v149_v3  ;;  %v145_v6 = vld [vmem:[%s137_s14 + $0x18] sm:$0xff]  ;;  %v148_v8 = vld [vmem:[%s137_s14 + $0x30] sm:$0xff]  ;;  %vm276_vm1 = vcmp.eq.s32.totalorder %v207_v13, %v2858_v15  ;;  %vm277_vm2 = vcmp.eq.s32.totalorder %v208_v14, %v2858_v15  ;;  %vm261_vm3 = vcmp.eq.s32.totalorder %v192_v17, %v2858_v15 }
  0x14   : > { %v2849_v9 = vmax.f32 %v143_v4, %v145_v6  ;;  %v2851_v10 = vmax.f32 %v146_v7, %v148_v8  ;;  %v142_v11 = vld [vmem:[%s137_s14] sm:$0xff]  ;;  %v144_v12 = vld [vmem:[%s137_s14 + $0x10] sm:$0xff]  ;;  %v340_v21 = vsel %vm276_vm1, 1.0, %v4711_v18  ;;  %v341_v22 = vsel %vm277_vm2, 1.0, %v4711_v18  ;;  %vm2942_vm8 = vmpackc.low %vm277_vm2, %vm276_vm1 }
  0x15   : > { %160 = vrot.lane.b32.xlu1 %v2847_v5, %s2811_s17  ;;  %v2861_v16 = vmax.f32 %v142_v11, %v144_v12  ;;  %v2881_v23 = vsub.f32 %v324_v19, %v324_v19  ;;  %v2883_v24 = vsub.f32 %v340_v21, %v340_v21  ;;  %v2885_v25 = vsub.f32 %v341_v22, %v341_v22  ;;  %vm2958_vm9 = vmpackc.low %vm261_vm3, %vm260_vm0 }
  0x16   : > { %156 = vrot.lane.b32.xlu0 %v2849_v9, %s2811_s17  ;;  %v325_v26 = vsel %vm261_vm3, 1.0, %v4711_v18  ;;  %vm278_vm4 = vcmp.eq.s32.totalorder %v209_v20, %v2858_v15  ;;  %v193_v30 = vadd.s32 16, %v2842_v1  ;;  %vm279_vm5 = vcmp.eq.s32.totalorder %v210_v27, %v2858_v15 }
  0x17   : > { %4867 = vst [vmem:[#allocation2_spill] sm:$0xff] %v2881_v23  ;;  %v4703_v28 = vand.u32 4294901760, %v2881_v23  ;;  %v2893_v29 = vsub.f32 %v325_v26, %v325_v26  ;;  %v4705_v31 = vand.u32 4294901760, %v2883_v24  ;;  %v4704_v32 = vand.u32 4294901760, %v2885_v25  ;;  %vm2967_vm10 = vmpackc.low %vm279_vm5, %vm278_vm4 }
  0x18   : > { %v342_v33 = vsel %vm278_vm4, 1.0, %v4711_v18  ;;  %v343_v36 = vsel %vm279_vm5, 1.0, %v4711_v18  ;;  %v194_v41 = vadd.s32 24, %v2842_v1  ;;  %vm262_vm6 = vcmp.eq.s32.totalorder %v193_v30, %v2858_v15 }
  0x19   : > { %154 = vrot.lane.b32.xlu1 %v2861_v16, %s2811_s17  ;;  %4868 = vst [vmem:[#allocation3_spill] sm:$0xff] %v2893_v29  ;;  %v471_v34 = vsub.f32 %v2881_v23, %v4703_v28  ;;  %v4696_v35 = vand.u32 4294901760, %v2893_v29  ;;  %v2911_v37 = vsub.f32 %v342_v33, %v342_v33  ;;  %v567_v38 = vsub.f32 %v2883_v24, %v4705_v31 }
  0x1a   : > { %158 = vrot.lane.b32.xlu0 %v2851_v10, %s2811_s17  ;;  %v573_v39 = vsub.f32 %v2885_v25, %v4704_v32  ;;  %v2919_v40 = vsub.f32 %v343_v36, %v343_v36  ;;  %vm263_vm7 = vcmp.eq.s32.totalorder %v194_v41, %v2858_v15  ;;  %v326_v50 = vsel %vm262_vm6, 1.0, %v4711_v18 }
  0x1b   : > { %4869 = vst [vmem:[#allocation4_spill] sm:$0xff] %v2911_v37  ;;  %v472_v42 = vand.u32 4294901760, %v471_v34  ;;  %v477_v43 = vsub.f32 %v2893_v29, %v4696_v35  ;;  %v4694_v44 = vand.u32 4294901760, %v2911_v37  ;;  %v568_v45 = vand.u32 4294901760, %v567_v38  ;;  %vm2998_vm13 = vmpackc.low %vm263_vm7, %vm262_vm6 }
  0x1c   : > { %4870 = vst [vmem:[#allocation5_spill] sm:$0xff] %v2919_v40  ;;  %v574_v46 = vand.u32 4294901760, %v573_v39  ;;  %v4691_v47 = vand.u32 4294901760, %v2919_v40  ;;  %v327_v51 = vsel %vm263_vm7, 1.0, %v4711_v18  ;;  %v4872_v52 = vsel %vm2942_vm8, 4294967295, %v4871_v52 }
  0x1d   : > { %v478_v48 = vand.u32 4294901760, %v477_v43  ;;  %v579_v49 = vsub.f32 %v2911_v37, %v4694_v44  ;;  %v2949_v55 = vsub.f32 %v326_v50, %v326_v50  ;;  %v2951_v56 = vsub.f32 %v327_v51, %v327_v51 }
  0x1e   : > { %v2438_v53 = vpack.c.bf16 %v574_v46, %v568_v45  ;;  %v585_v54 = vsub.f32 %v2919_v40, %v4691_v47  ;;  %v211_v60 = vadd.s32 160, %v2842_v1  ;;  %v4709_v3 = vmov 1.0|1.0   ;;  %v5050_v61 = vld [vmem:[#allocation2_spill] sm:$0xff] }
  0x1f   : > { %4873 = vst [vmem:[#allocation6_spill] sm:$0xff] %v2949_v55  ;;  %4874 = vst [vmem:[#allocation7_spill] sm:$0xff] %v2951_v56  ;;  %v2440_v58 = vpack.c.bf16 %v478_v48, %v472_v42  ;;  %v580_v59 = vand.u32 4294901760, %v579_v49  ;;  %v4689_v63 = vand.u32 4294901760, %v2949_v55  ;;  %v4688_v2 = vand.u32 4294901760, %v2951_v56  ;;  %2407 = vmatprep.subr.msk.bf16.mxu0 %vm2942_vm8, %v4709_v3 }
  0x20   : > { %2439 = vmatprep.subr.bf16.mxu1 %v2438_v53  ;;  %v586_v62 = vand.u32 4294901760, %v585_v54  ;;  %v212_v4 = vadd.s32 168, %v2842_v1  ;;  %vm280_vm11 = vcmp.eq.s32.totalorder %v211_v60, %v2858_v15  ;;  %2409 = vmatpush3.bf16.msk.msra.mxu0 %vm2958_vm9, %v4709_v3  ;;  %v195_v6 = vadd.s32 32, %v2842_v1 }
  0x21   : > { %2441 = vmatpush3.bf16.msra.mxu1 %v2440_v58  ;;  %v196_v7 = vadd.s32 40, %v2842_v1  ;;  %v213_v8 = vadd.s32 176, %v2842_v1  ;;  %v483_v12 = vsub.f32 %v2949_v55, %v4689_v63  ;;  %v489_v13 = vsub.f32 %v2951_v56, %v4688_v2  ;;  %2411 = vmatprep.subr.msk.bf16.mxu0 %vm2967_vm10, %v4709_v3 }
  0x22   : > { %v2442_v11 = vpack.c.bf16 %v586_v62, %v580_v59  ;;  %vm281_vm12 = vcmp.eq.s32.totalorder %v212_v4, %v2858_v15  ;;  %v4879_v14 = vmov 0  ;;  %v344_v17 = vsel %vm280_vm11, 1.0, %v4711_v18 }
  0x23   : > { %v4880_v14 = vsel %vm2998_vm13, 4294967295, %v4879_v14  ;;  %v345_v19 = vsel %vm281_vm12, 1.0, %v4711_v18  ;;  %vm264_vm14 = vcmp.eq.s32.totalorder %v195_v6, %v2858_v15  ;;  %vm265_vm15 = vcmp.eq.s32.totalorder %v196_v7, %v2858_v15  ;;  %vm3010_vm0 = vmpackc.low %vm281_vm12, %vm280_vm11 }
  0x24   : > { %4881 = vst [vmem:[#allocation8_spill] sm:$0xff] %v4880_v14  ;;  %v4882_v20 = vmov 0  ;;  %2443 = vmatprep.subr.bf16.mxu1 %v2442_v11  ;;  %v484_v21 = vand.u32 4294901760, %v483_v12  ;;  %v490_v22 = vand.u32 4294901760, %v489_v13  ;;  %v3014_v26 = vsub.f32 %v344_v17, %v344_v17  ;;  %2413 = vmatpush3.bf16.msk.msra.mxu0 %vm2998_vm13, %v4709_v3  ;;  %vm3040_vm2 = vmpackc.low %vm265_vm15, %vm264_vm14 }
  0x25   : > { %v4883_v20 = vsel %vm3010_vm0, 4294967295, %v4882_v20  ;;  %v3016_v27 = vsub.f32 %v345_v19, %v345_v19  ;;  %v328_v30 = vsel %vm264_vm14, 1.0, %v4711_v18  ;;  %v329_v33 = vsel %vm265_vm15, 1.0, %v4711_v18  ;;  %2415 = vmatprep.subr.msk.bf16.mxu0 %vm3010_vm0, %v4709_v3 }
  0x26   : > { %4884 = vst [vmem:[#allocation9_spill] sm:$0xff] %v4883_v20  ;;  %4885 = vst [vmem:[#allocation10_spill] sm:$0xff] %v3014_v26  ;;  %v214_v34 = vadd.s32 184, %v2842_v1  ;;  %vm282_vm1 = vcmp.eq.s32.totalorder %v213_v8, %v2858_v15  ;;  %v2444_v36 = vpack.c.bf16 %v490_v22, %v484_v21  ;;  %v4687_v38 = vand.u32 4294901760, %v3014_v26 }
  0x27   : > { %4886 = vst [vmem:[#allocation11_spill] sm:$0xff] %v3016_v27  ;;  %v4686_v39 = vand.u32 4294901760, %v3016_v27  ;;  %v3031_v41 = vsub.f32 %v328_v30, %v328_v30  ;;  %v4888_v42 = vmov 0  ;;  %v3044_v43 = vsub.f32 %v329_v33, %v329_v33 }
  0x28   : > { %v4889_v42 = vsel %vm3040_vm2, 4294967295, %v4888_v42  ;;  %vm283_vm3 = vcmp.eq.s32.totalorder %v214_v34, %v2858_v15  ;;  %v346_v45 = vsel %vm282_vm1, 1.0, %v4711_v18  ;;  %v197_v46 = vadd.s32 48, %v2842_v1  ;;  %2445 = vmatpush3.bf16.msra.mxu1 %v2444_v36  ;;  %2417 = vmatpush3.bf16.msk.msra.mxu0 %vm3040_vm2, %v4709_v3 }
  0x29   : > { %4887 = vst [vmem:[#allocation12_spill] sm:$0xff] %v3031_v41  ;;  %4890 = vst [vmem:[#allocation13_spill] sm:$0xff] %v4889_v42  ;;  %v591_v48 = vsub.f32 %v3014_v26, %v4687_v38  ;;  %v597_v49 = vsub.f32 %v3016_v27, %v4686_v39  ;;  %v4685_v50 = vand.u32 4294901760, %v3031_v41  ;;  %v347_v51 = vsel %vm283_vm3, 1.0, %v4711_v18 }
  0x2a   : > { %4891 = vst [vmem:[#allocation14_spill] sm:$0xff] %v3044_v43  ;;  %vm3061_vm4 = vmpackc.low %vm283_vm3, %vm282_vm1  ;;  %v4892_v53 = vmov 0  ;;  %v4682_v54 = vand.u32 4294901760, %v3044_v43  ;;  %v3066_v58 = vsub.f32 %v346_v45, %v346_v45  ;;  %v3068_v59 = vsub.f32 %v347_v51, %v347_v51 }
  0x2b   : > { %v4893_v53 = vsel %vm3061_vm4, 4294967295, %v4892_v53  ;;  %v198_v60 = vadd.s32 56, %v2842_v1  ;;  %v592_v62 = vand.u32 4294901760, %v591_v48  ;;  %v598_v4 = vand.u32 4294901760, %v597_v49  ;;  %2419 = vmatprep.subr.msk.bf16.mxu0 %vm3061_vm4, %v4709_v3 }
  0x2c   : > { %4894 = vst [vmem:[#allocation15_spill] sm:$0xff] %v4893_v53  ;;  %4895 = vst [vmem:[#allocation16_spill] sm:$0xff] %v3066_v58  ;;  %v495_v6 = vsub.f32 %v3031_v41, %v4685_v50  ;;  %vm266_vm5 = vcmp.eq.s32.totalorder %v197_v46, %v2858_v15  ;;  %v501_v7 = vsub.f32 %v3044_v43, %v4682_v54  ;;  %v4681_v8 = vand.u32 4294901760, %v3066_v58 }
  0x2d   : > { %4896 = vst [vmem:[#allocation17_spill] sm:$0xff] %v3068_v59  ;;  %v4680_v11 = vand.u32 4294901760, %v3068_v59  ;;  %vm267_vm6 = vcmp.eq.s32.totalorder %v198_v60, %v2858_v15  ;;  %v2446_v12 = vpack.c.bf16 %v598_v4, %v592_v62  ;;  %v330_v17 = vsel %vm266_vm5, 1.0, %v4711_v18 }
  0x2e   : > { %v496_v13 = vand.u32 4294901760, %v495_v6  ;;  %v331_v19 = vsel %vm267_vm6, 1.0, %v4711_v18  ;;  %vm3089_vm7 = vmpackc.low %vm267_vm6, %vm266_vm5  ;;  %v4897_v21 = vmov 0  ;;  %v502_v22 = vand.u32 4294901760, %v501_v7 }
  0x2f   : > { %v4898_v21 = vsel %vm3089_vm7, 4294967295, %v4897_v21  ;;  %v603_v30 = vsub.f32 %v3066_v58, %v4681_v8  ;;  %v609_v33 = vsub.f32 %v3068_v59, %v4680_v11  ;;  %v3099_v34 = vsub.f32 %v330_v17, %v330_v17  ;;  %2421 = vmatpush3.bf16.msk.msra.mxu0 %vm3089_vm7, %v4709_v3  ;;  %2447 = vmatprep.subr.bf16.mxu1 %v2446_v12 }
  0x30   : > { %4899 = vst [vmem:[#allocation18_spill] sm:$0xff] %v4898_v21  ;;  %v3104_v36 = vsub.f32 %v331_v19, %v331_v19  ;;  %v3107_v45 = vadd.s32 192, %v2842_v1  ;;  %v3110_v46 = vadd.s32 200, %v2842_v1  ;;  %v3113_v48 = vadd.s32 64, %v2842_v1 }
  0x31   : > { %v2448_v49 = vpack.c.bf16 %v502_v22, %v496_v13  ;;  %v604_v51 = vand.u32 4294901760, %v603_v30  ;;  %v610_v60 = vand.u32 4294901760, %v609_v33  ;;  %v4679_v62 = vand.u32 4294901760, %v3099_v34 }
  0x32   : > { %v4678_v4 = vand.u32 4294901760, %v3104_v36  ;;  %vm284_vm11 = vcmp.eq.s32.totalorder %v3107_v45, %v2858_v15  ;;  %vm285_vm12 = vcmp.eq.s32.totalorder %v3110_v46, %v2858_v15  ;;  %v3122_v6 = vadd.s32 72, %v2842_v1 }
  0x33   : > { %2449 = vmatpush3.bf16.msra.mxu1 %v2448_v49  ;;  %v2450_v7 = vpack.c.bf16 %v610_v60, %v604_v51  ;;  %v507_v12 = vsub.f32 %v3099_v34, %v4679_v62  ;;  %v348_v13 = vsel %vm284_vm11, 1.0, %v4711_v18  ;;  %v349_v17 = vsel %vm285_vm12, 1.0, %v4711_v18 }
  0x34   : > { %v513_v19 = vsub.f32 %v3104_v36, %v4678_v4  ;;  %v3138_v22 = vsub.f32 %v348_v13, %v348_v13  ;;  %v3140_v30 = vsub.f32 %v349_v17, %v349_v17  ;;  %vm268_vm14 = vcmp.eq.s32.totalorder %v3113_v48, %v2858_v15 }
  0x35   : > { %2451 = vmatprep.subr.bf16.mxu1 %v2450_v7  ;;  %v508_v33 = vand.u32 4294901760, %v507_v12  ;;  %vm269_vm15 = vcmp.eq.s32.totalorder %v3122_v6, %v2858_v15  ;;  %v332_v49 = vsel %vm268_vm14, 1.0, %v4711_v18  ;;  %v3151_v51 = vadd.s32 208, %v2842_v1 }
  0x36   : > { %4900 = vst [vmem:[#allocation19_spill] sm:$0xff] %v3138_v22  ;;  %4901 = vst [vmem:[#allocation20_spill] sm:$0xff] %v3140_v30  ;;  %v514_v60 = vand.u32 4294901760, %v513_v19  ;;  %v4683_v13 = vand.u32 4294901760, %v3138_v22  ;;  %v4684_v17 = vand.u32 4294901760, %v3140_v30  ;;  %v333_v7 = vsel %vm269_vm15, 1.0, %v4711_v18 }
  0x37   : > { %v3159_v12 = vsub.f32 %v332_v49, %v332_v49  ;;  %v3161_v4 = vsub.f32 %v333_v7, %v333_v7  ;;  %v3164_v62 = vadd.s32 216, %v2842_v1  ;;  %vm4700_vm1 = vcmp.eq.s32.totalorder %v3151_v51, %v2858_v15 }
  0x38   : > { %v2452_v19 = vpack.c.bf16 %v514_v60, %v508_v33  ;;  %v615_v11 = vsub.f32 %v3138_v22, %v4683_v13  ;;  %v621_v8 = vsub.f32 %v3140_v30, %v4684_v17  ;;  %v350_v49 = vsel %vm4700_vm1, 1.0, %v4711_v18 }
  0x39   : > { %4902 = vst [vmem:[#allocation21_spill] sm:$0xff] %v3159_v12  ;;  %4903 = vst [vmem:[#allocation22_spill] sm:$0xff] %v3161_v4  ;;  %v4690_v7 = vand.u32 4294901760, %v3159_v12  ;;  %v4693_v54 = vand.u32 4294901760, %v3161_v4  ;;  %vm4699_vm3 = vcmp.eq.s32.totalorder %v3164_v62, %v2858_v15  ;;  %v3182_v33 = vsub.f32 %v350_v49, %v350_v49 }
  0x3a   : > { %2453 = vmatpush3.bf16.msra.mxu1 %v2452_v19  ;;  %v616_v60 = vand.u32 4294901760, %v615_v11  ;;  %v622_v13 = vand.u32 4294901760, %v621_v8  ;;  %v351_v17 = vsel %vm4699_vm3, 1.0, %v4711_v18  ;;  %v3189_v50 = vadd.s32 80, %v2842_v1 }
  0x3b   : > { %4904 = vst [vmem:[#allocation23_spill] sm:$0xff] %v3182_v33  ;;  %v519_v39 = vsub.f32 %v3159_v12, %v4690_v7  ;;  %v525_v49 = vsub.f32 %v3161_v4, %v4693_v54  ;;  %v4692_v19 = vand.u32 4294901760, %v3182_v33  ;;  %v3198_v11 = vsub.f32 %v351_v17, %v351_v17 }
  0x3c   : > { %v2454_v8 = vpack.c.bf16 %v622_v13, %v616_v60  ;;  %v3201_v38 = vadd.s32 88, %v2842_v1  ;;  %vm4698_vm5 = vcmp.eq.s32.totalorder %v3189_v50, %v2858_v15  ;;  %v3279_v28 = vadd.s32 240, %v2842_v1 }
  0x3d   : > { %4905 = vst [vmem:[#allocation24_spill] sm:$0xff] %v3198_v11  ;;  %v520_v2 = vand.u32 4294901760, %v519_v39  ;;  %v526_v63 = vand.u32 4294901760, %v525_v49  ;;  %v627_v7 = vsub.f32 %v3182_v33, %v4692_v19  ;;  %v4695_v47 = vand.u32 4294901760, %v3198_v11 }
  0x3e   : > { %2455 = vmatprep.subr.bf16.mxu1 %v2454_v8  ;;  %vm4697_vm6 = vcmp.eq.s32.totalorder %v3201_v38, %v2858_v15  ;;  %v334_v13 = vsel %vm4698_vm5, 1.0, %v4711_v18  ;;  %v3287_v31 = vadd.s32 112, %v2842_v1  ;;  %v3290_v0 = vadd.s32 120, %v2842_v1 }
  0x3f   : > { %v2456_v17 = vpack.c.bf16 %v526_v63, %v520_v2  ;;  %v628_v60 = vand.u32 4294901760, %v627_v7  ;;  %v633_v39 = vsub.f32 %v3198_v11, %v4695_v47  ;;  %v335_v49 = vsel %vm4697_vm6, 1.0, %v4711_v18 }
  0x40   : > { %v3222_v8 = vsub.f32 %v334_v13, %v334_v13  ;;  %v3224_v19 = vsub.f32 %v335_v49, %v335_v49  ;;  %v4908_v21 = vmov 0.0   ;;  %v4915_v45 = vmov 0 }
  0x41   : > { %2457 = vmatpush3.bf16.msra.mxu1 %v2456_v17  ;;  %v634_v54 = vand.u32 4294901760, %v633_v39  ;;  %v3235_v17 = vadd.s32 224, %v2842_v1  ;;  %v3238_v39 = vadd.s32 232, %v2842_v1  ;;  %v4919_v6 = vlaneseq }
  0x42   : > { %4906 = vst [vmem:[#allocation25_spill] sm:$0xff] %v3222_v8  ;;  %4907 = vst [vmem:[#allocation26_spill] sm:$0xff] %v3224_v19  ;;  %v4702_v44 = vand.u32 4294901760, %v3222_v8  ;;  %v4701_v63 = vand.u32 4294901760, %v3224_v19  ;;  %v3915_v57 = vadd.s32 256, %v2842_v1 }
  0x43   : > { %v2458_v2 = vpack.c.bf16 %v634_v54, %v628_v60  ;;  %v3241_v54 = vadd.s32 96, %v2842_v1  ;;  %v3244_v60 = vadd.s32 104, %v2842_v1  ;;  %vm4742_vm6 = vcmp.eq.s32.totalorder %v3235_v17, %v2858_v15 }
  0x44   : > { %v531_v7 = vsub.f32 %v3222_v8, %v4702_v44  ;;  %v537_v47 = vsub.f32 %v3224_v19, %v4701_v63  ;;  %vm4739_vm5 = vcmp.eq.s32.totalorder %v3238_v39, %v2858_v15 }
  0x45   : > { %2459 = vmatprep.subr.bf16.mxu1 %v2458_v2  ;;  %vm4708_vm3 = vcmp.eq.s32.totalorder %v3241_v54, %v2858_v15  ;;  %vm4707_vm1 = vcmp.eq.s32.totalorder %v3244_v60, %v2858_v15 }
  0x46   : > { %v532_v13 = vand.u32 4294901760, %v531_v7  ;;  %v538_v35 = vand.u32 4294901760, %v537_v47  ;;  %v353_v47 = vsel %vm4739_vm5, 1.0, %v4711_v18  ;;  %vm3342_vm5 = vmpackc.low %vm285_vm12, %vm284_vm11  ;;  %vm4920_vm12 = vcmp.eq.s32.totalorder %v3151_v51, %v2858_v15 }
  0x47   : > { %v3264_v7 = vsub.f32 %v353_v47, %v353_v47  ;;  %vm3361_vm11 = vmpackc.low %vm269_vm15, %vm268_vm14  ;;  %vm4921_vm14 = vcmp.eq.s32.totalorder %v3164_v62, %v2858_v15  ;;  %v4927_v51 = vmov 0 }
  0x48   : > { %v2460_v49 = vpack.c.bf16 %v538_v35, %v532_v13  ;;  %v352_v35 = vsel %vm4742_vm6, 1.0, %v4711_v18  ;;  %v336_v13 = vsel %vm4708_vm3, 1.0, %v4711_v18  ;;  %v4916_v45 = vsel %vm3361_vm11, 4294967295, %v4915_v45  ;;  %vm3381_vm15 = vmpackc.low %vm4921_vm14, %vm4920_vm12 }
  0x49   : > { %v3262_v2 = vsub.f32 %v352_v35, %v352_v35  ;;  %v3274_v63 = vsub.f32 %v336_v13, %v336_v13  ;;  %v3282_v35 = vadd.s32 248, %v2842_v1  ;;  %v4724_v32 = vand.u32 4294901760, %v3264_v7  ;;  %4917 = vst [vmem:[#allocation28_spill] sm:$0xff] %v4916_v45 }
  0x4a   : > { %2461 = vmatpush3.bf16.msra.mxu1 %v2460_v49  ;;  %v337_v49 = vsel %vm4707_vm1, 1.0, %v4711_v18  ;;  %vm4729_vm1 = vcmp.eq.s32.totalorder %v3279_v28, %v2858_v15  ;;  %vm4930_vm12 = vcmp.eq.s32.totalorder %v3238_v39, %v2858_v15 }
  0x4b   : > { %v3276_v44 = vsub.f32 %v337_v49, %v337_v49  ;;  %v4719_v47 = vand.u32 4294901760, %v3262_v2  ;;  %vm4730_vm3 = vcmp.eq.s32.totalorder %v3282_v35, %v2858_v15  ;;  %v645_v18 = vsub.f32 %v3264_v7, %v4724_v32 }
  0x4c   : > { %v354_v13 = vsel %vm4729_vm1, 1.0, %v4908_v21  ;;  %v355_v49 = vsel %vm4730_vm3, 1.0, %v4908_v21  ;;  %v4909_v19 = vand.u32 4294901760, %v3274_v63  ;;  %vm4741_vm1 = vcmp.eq.s32.totalorder %v3287_v31, %v2858_v15 }
  0x4d   : > { %v639_v3 = vsub.f32 %v3262_v2, %v4719_v47  ;;  %v4910_v47 = vand.u32 4294901760, %v3276_v44  ;;  %v3318_v33 = vsub.f32 %v354_v13, %v354_v13  ;;  %v3320_v32 = vsub.f32 %v355_v49, %v355_v49 }
  0x4e   : > { %v543_v8 = vsub.f32 %v3274_v63, %v4909_v19  ;;  %v646_v42 = vand.u32 4294901760, %v645_v18  ;;  %vm4740_vm3 = vcmp.eq.s32.totalorder %v3290_v0, %v2858_v15  ;;  %v163_v49 = vand.u32 127, %v4919_v6 }
  0x4f   : > { %v549_v11 = vsub.f32 %v3276_v44, %v4910_v47  ;;  %v640_v53 = vand.u32 4294901760, %v639_v3  ;;  %v4757_v19 = vand.u32 4294901760, %v3318_v33  ;;  %v4756_v30 = vand.u32 4294901760, %v3320_v32 }
  0x50   : > { %v544_v4 = vand.u32 4294901760, %v543_v8  ;;  %v338_v47 = vsel %vm4741_vm1, 1.0, %v4908_v21  ;;  %v339_v18 = vsel %vm4740_vm3, 1.0, %v4908_v21  ;;  %v4911_v3 = vmov 0 }
  0x51   : > { %v550_v12 = vand.u32 4294901760, %v549_v11  ;;  %v2462_v22 = vpack.c.bf16 %v646_v42, %v640_v53  ;;  %v4912_v3 = vsel %vm3342_vm5, 4294967295, %v4911_v3  ;;  %v651_v53 = vsub.f32 %v3318_v33, %v4757_v19 }
  0x52   : > { %4913 = vst [vmem:[#allocation27_spill] sm:$0xff] %v4912_v3  ;;  %v657_v11 = vsub.f32 %v3320_v32, %v4756_v30  ;;  %v4914_v8 = vmov 1.0|1.0   ;;  %v3365_v46 = vsub.f32 %v338_v47, %v338_v47  ;;  %v4922_v47 = vmov 0 }
  0x53   : > { %v2464_v42 = vpack.c.bf16 %v550_v12, %v544_v4  ;;  %2423 = vmatprep.subr.msk.bf16.mxu0 %vm3342_vm5, %v4914_v8  ;;  %2463 = vmatprep.subr.bf16.mxu1 %v2462_v22  ;;  %v3367_v4 = vsub.f32 %v339_v18, %v339_v18  ;;  %v652_v22 = vand.u32 4294901760, %v651_v53  ;;  %v4923_v47 = vsel %vm3381_vm15, 4294967295, %v4922_v47 }
  0x54   : > { %4918 = vst [vmem:[#allocation29_spill] sm:$0xff] %v3365_v46  ;;  %2425 = vmatpush3.bf16.msk.msra.mxu0 %vm3361_vm11, %v4914_v8  ;;  %v658_v12 = vand.u32 4294901760, %v657_v11  ;;  %v4755_v48 = vand.u32 4294901760, %v3365_v46  ;;  %4924 = vst [vmem:[#allocation30_spill] sm:$0xff] %v4923_v47  ;;  %vm4925_vm3 = vcmp.eq.s32.totalorder %v3189_v50, %v2858_v15  ;;  %vm4926_vm1 = vcmp.eq.s32.totalorder %v3201_v38, %v2858_v15 }
  0x55   : > { %2465 = vmatpush3.bf16.msra.mxu1 %v2464_v42  ;;  %v4754_v13 = vand.u32 4294901760, %v3367_v4  ;;  %2427 = vmatprep.subr.msk.bf16.mxu0 %vm3381_vm15, %v4914_v8  ;;  %vm3394_vm6 = vmpackc.low %vm4926_vm1, %vm4925_vm3  ;;  %vm4929_vm3 = vcmp.eq.s32.totalorder %v3235_v17, %v2858_v15  ;;  %vm4934_vm1 = vcmp.eq.s32.totalorder %v3244_v60, %v2858_v15  ;;  %v4935_v17 = vmov 0 }
  0x56   : > { %v2466_v18 = vpack.c.bf16 %v658_v12, %v652_v22  ;;  %v4928_v51 = vsel %vm3394_vm6, 4294967295, %v4927_v51  ;;  %v555_v62 = vsub.f32 %v3365_v46, %v4755_v48  ;;  %vm3413_vm14 = vmpackc.low %vm4930_vm12, %vm4929_vm3  ;;  %v4931_v22 = vmov 0 }
  0x57   : > { %v561_v53 = vsub.f32 %v3367_v4, %v4754_v13  ;;  %v4932_v22 = vsel %vm3413_vm14, 4294967295, %v4931_v22  ;;  %vm4937_vm3 = vcmp.lt.s32.totalorder %v163_v49, 127  ;;  %v3685_v3 = vadd.s32 352, %v2842_v1 }
  0x58   : > { %2467 = vmatprep.subr.bf16.mxu1 %v2466_v18  ;;  %2429 = vmatpush3.bf16.msk.msra.mxu0 %vm3394_vm6, %v4914_v8  ;;  %v556_v50 = vand.u32 4294901760, %v555_v62  ;;  %vm4933_vm6 = vcmp.eq.s32.totalorder %v3241_v54, %v2858_v15  ;;  %vm4938_vm12 = vmmov %vm4937_vm3 }
  0x59   : > { %v562_v38 = vand.u32 4294901760, %v561_v53  ;;  %2431 = vmatprep.subr.msk.bf16.mxu0 %vm3413_vm14, %v4914_v8  ;;  %vm3426_vm15 = vmpackc.low %vm4934_vm1, %vm4933_vm6  ;;  %vm4940_vm6 = vcmp.eq.s32.totalorder %v3279_v28, %v2858_v15  ;;  %vm4941_vm1 = vcmp.eq.s32.totalorder %v3282_v35, %v2858_v15  ;;  %vm4946_vm14 = vcmp.eq.s32.totalorder %v3290_v0, %v2858_v15 }
  0x5a   : > { %v4936_v17 = vsel %vm3426_vm15, 4294967295, %v4935_v17  ;;  %v2470_v28 = vpack.c.bf16 %v2885_v25, %v2883_v24  ;;  %v3567_v0 = vadd.s32 328, %v2842_v1 }
  0x5b   : > { %v2468_v12 = vpack.c.bf16 %v562_v38, %v556_v50 }
  0x5c   : > { %2433 = vmatpush3.bf16.msk.msra.mxu0 %vm3426_vm15, %v4914_v8  ;;  %vm3448_vm15 = vmpackc.low %vm4941_vm1, %vm4940_vm6  ;;  %4960 = vst [vmem:[#allocation43_spill] sm:$0xff] %v3567_v0 }
  0x5d   : > { %2469 = vmatpush3.bf16.msra.mxu1 %v2468_v12  ;;  %2435 = vmatprep.subr.msk.bf16.mxu0 %vm3448_vm15, %v4914_v8 }
  0x5e   : > { %2503 = vmatprep.subr.msk.bf16.mxu1 %vm2942_vm8, %v4914_v8  ;;  %vm4945_vm8 = vcmp.eq.s32.totalorder %v3287_v31, %v2858_v15 }
  0x5f   : > { %vm3463_vm11 = vmpackc.low %vm4946_vm14, %vm4945_vm8  ;;  %vm181_vm8 = vcmp.lt.s32.totalorder %v163_v49, 112  ;;  %v3495_v49 = vadd.s32 432, %v2842_v1 }
  0x60   : > { %2437 = vmatpush3.bf16.msk.msra.mxu0 %vm3463_vm11, %v4914_v8 }
  0x61   : > { %2471 = vmatprep.subr.bf16.mxu0 %v2470_v28  ;;  %4952 = vst [vmem:[#allocation35_spill] sm:$0xff] %v3495_v49  ;;  %vm4805_vm14 = vcmp.eq.s32.totalorder %v3495_v49, %v2858_v15  ;;  %v3579_v49 = vadd.s32 464, %v2842_v1 }
  0x63   : > { %4961 = vst [vmem:[#allocation44_spill] sm:$0xff] %v3579_v49 }
  0x87   : > { %v161_v42 = vpop.permute.xlu1 %160 }
  0x88   : > { %v157_v11 = vpop.permute.xlu0 %156 }
  0x8b   : > { %v155_v6 = vpop.permute.xlu1 %154 }
  0x8c   : > { %v159_v39 = vpop.permute.xlu0 %158  ;;  %v167_v50 = vsel %vm4937_vm3, %v155_v6, %v157_v11 }
  0x8d   : > { %v165_v18 = vsel %vm4937_vm3, %v159_v39, %v161_v42  ;;  %v166_v62 = vsel %vm4938_vm12, %v157_v11, %v159_v39  ;;  %vm4944_vm12 = vmmov %vm4937_vm3  ;;  %v169_v31 = vmax.f32 %v2861_v16, %v167_v50  ;;  %v2478_v11 = vpack.c.bf16 %v3016_v27, %v3014_v26  ;;  %v4965_v26 = vld [vmem:[#allocation22_spill] sm:$0xff] }
  0x8e   : > { %v170_v54 = vmax.f32 %v2849_v9, %v166_v62  ;;  %v3437_v53 = vmax.f32 %v2851_v10, %v165_v18  ;;  %v168_v9 = vsel %vm4944_vm12, %v161_v42, %v155_v6 }
  0x8f   : > { %v3475_v35 = vmax.f32 %v2847_v5, %v168_v9 }
  0x90   : > { %4939 = vst [vmem:[#allocation31_spill] sm:$0xff] %v3437_v53  ;;  %175 = vrot.lane.b32.xlu0 %v170_v54, %s2814_s18  ;;  %177 = vrot.lane.b32.xlu1 %v3437_v53, %s2814_s18  ;;  %v378_v53 = vsel %vm4805_vm14, 1.0, %v4908_v21 }
  0x91   : > { %4949 = vst [vmem:[#allocation32_spill] sm:$0xff] %v3475_v35  ;;  %v3583_v27 = vsub.f32 %v378_v53, %v378_v53 }
  0x94   : > { %179 = vrot.lane.b32.xlu1 %v3475_v35, %s2814_s18  ;;  %173 = vrot.lane.b32.xlu0 %v169_v31, %s2814_s18  ;;  %v4963_v35 = vld [vmem:[#allocation20_spill] sm:$0xff] }
 0x102   : > { %v176_v16 = vpop.permute.xlu0 %175  ;;  %v178_v5 = vpop.permute.xlu1 %177 }
 0x103   : > { %v183_v12 = vsel %vm181_vm8, %v176_v16, %v178_v5 }
 0x104   : > { %v187_v39 = vmax.f32 %v170_v54, %v183_v12  ;;  %v3500_v12 = vadd.s32 440, %v2842_v1 }
 0x106   : > { %v3486_v6 = vand.u32 4294901760, %v187_v39  ;;  %v174_v18 = vpop.permute.xlu0 %173  ;;  %v180_v62 = vpop.permute.xlu1 %179  ;;  %4954 = vst [vmem:[#allocation37_spill] sm:$0xff] %v3500_v12  ;;  %vm4804_vm6 = vcmp.eq.s32.totalorder %v3500_v12, %v2858_v15 }
 0x107   : > { %v184_v50 = vsel %vm181_vm8, %v174_v18, %v176_v16  ;;  %v3488_v9 = vsel %vm181_vm8, %v178_v5, %v180_v62  ;;  %v3490_v28 = vsel %vm181_vm8, %v180_v62, %v174_v18  ;;  %v3503_v16 = vadd.s32 304, %v2842_v1 }
 0x108   : > { %4950 = vst [vmem:[#allocation33_spill] sm:$0xff] %v3488_v9  ;;  %4951 = vst [vmem:[#allocation34_spill] sm:$0xff] %v3490_v28  ;;  %v453_v13 = vsub.f32 %v187_v39, %v3486_v6  ;;  %v186_v48 = vmax.f32 %v169_v31, %v184_v50  ;;  %661 = vmatprep.mubr.f32.mxu1 %v3486_v6  ;;  %v3510_v39 = vadd.s32 312, %v2842_v1  ;;  %v3513_v18 = vadd.s32 448, %v2842_v1 }
 0x109   : > { %4955 = vst [vmem:[#allocation38_spill] sm:$0xff] %v3503_v16  ;;  %v2472_v62 = vpack.c.bf16 %v2893_v29, %v2881_v23  ;;  %v3525_v50 = vadd.s32 456, %v2842_v1  ;;  %vm4780_vm1 = vcmp.eq.s32.totalorder %v3503_v16, %v2858_v15  ;;  %v4964_v16 = vld [vmem:[#allocation21_spill] sm:$0xff]  ;;  %v3602_v28 = vadd.s32 472, %v2842_v1 }
 0x10a   : > { %v3497_v30 = vand.u32 4294901760, %v186_v48  ;;  %v454_v54 = vand.u32 4294901760, %v453_v13  ;;  %4956 = vst [vmem:[#allocation39_spill] sm:$0xff] %v3510_v39  ;;  %4957 = vst [vmem:[#allocation40_spill] sm:$0xff] %v3513_v18  ;;  %vm4773_vm3 = vcmp.eq.s32.totalorder %v3510_v39, %v2858_v15  ;;  %vm4772_vm12 = vcmp.eq.s32.totalorder %v3513_v18, %v2858_v15  ;;  %v4972_v39 = vld [vmem:[#allocation24_spill] sm:$0xff] }
 0x10b   : > { %4958 = vst [vmem:[#allocation41_spill] sm:$0xff] %v3525_v50  ;;  %vm4774_vm8 = vcmp.eq.s32.totalorder %v3525_v50, %v2858_v15  ;;  %v362_v12 = vsel %vm4780_vm1, 1.0, %v4908_v21  ;;  %v380_v9 = vsel %vm4772_vm12, 1.0, %v4908_v21  ;;  %v4971_v50 = vld [vmem:[#allocation23_spill] sm:$0xff]  ;;  %vm4787_vm1 = vcmp.eq.s32.totalorder %v3602_v28, %v2858_v15 }
 0x10c   : > { %4953 = vst [vmem:[#allocation36_spill] sm:$0xff] %v3497_v30  ;;  %v3506_v5 = vsub.f32 %v186_v48, %v3497_v30  ;;  %663 = vmatmul.mubr.f32.vlgmr.msra.gmra.mrb[0].mxu1 %v3497_v30  ;;  %v455_v31 = vsub.f32 %v453_v13, %v454_v54  ;;  %v2474_v48 = vpack.c.bf16 %v2919_v40, %v2911_v37  ;;  %v4962_v30 = vld [vmem:[#allocation19_spill] sm:$0xff]  ;;  %v381_v53 = vsel %vm4774_vm8, 1.0, %v4908_v21  ;;  %v4973_v40 = vld [vmem:[#allocation25_spill] sm:$0xff] }
 0x10d   : > { %2505 = vmatpush3.bf16.msk.msra.mxu1 %vm2958_vm9, %v4914_v8  ;;  %841 = vmatprep.mubr.f32.mxu1 %v454_v54  ;;  %v2476_v54 = vpack.c.bf16 %v2951_v56, %v2949_v55  ;;  %4966 = vst [vmem:[#allocation19_spill] sm:$0xff] %v3602_v28  ;;  %v3607_v18 = vsub.f32 %v362_v12, %v362_v12  ;;  %v3623_v12 = vadd.s32 344, %v2842_v1  ;;  %v3657_v37 = vadd.s32 480, %v2842_v1 }
 0x10e   : > { %2507 = vmatprep.subr.msk.bf16.mxu1 %vm2967_vm10, %v4914_v8  ;;  %v456_v19 = vand.u32 4294901760, %v455_v31  ;;  %v4759_v38 = vand.u32 4294901760, %v3506_v5  ;;  %vm4790_vm8 = vcmp.eq.s32.totalorder %v3579_v49, %v2858_v15  ;;  %v3703_v49 = vadd.s32 496, %v2842_v1 }
 0x10f   : > { %4969 = vst [vmem:[#allocation21_spill] sm:$0xff] %v3623_v12  ;;  %v382_v20 = vsel %vm4790_vm8, 1.0, %v4908_v21  ;;  %4976 = vst [vmem:[#allocation22_spill] sm:$0xff] %v3657_v37  ;;  %vm4987_vm8 = vnez %v4923_v47  ;;  %v3720_v28 = vadd.s32 376, %v2842_v1 }
 0x110   : > { %457 = vmatprep.mubr.f32.mxu0 %v456_v19  ;;  %v461_v31 = vsub.f32 %v3506_v5, %v4759_v38  ;;  %v379_v19 = vsel %vm4804_vm6, 1.0, %v4908_v21  ;;  %v3564_v38 = vadd.s32 320, %v2842_v1  ;;  %4984 = vst [vmem:[#allocation46_spill] sm:$0xff] %v3703_v49  ;;  %vm4808_vm14 = vcmp.eq.s32.totalorder %v3703_v49, %v2858_v15 }
 0x111   : > { %2509 = vmatpush3.bf16.msk.msra.mxu1 %vm2998_vm13, %v4914_v8  ;;  %v3595_v55 = vsub.f32 %v379_v19, %v379_v19  ;;  %4989 = vst [vmem:[#allocation49_spill] sm:$0xff] %v3720_v28 }
 0x112   : > { %4959 = vst [vmem:[#allocation42_spill] sm:$0xff] %v3564_v38  ;;  %2511 = vmatprep.subr.msk.bf16.mxu1 %vm3010_vm0, %v4914_v8  ;;  %v462_v42 = vand.u32 4294901760, %v461_v31  ;;  %v363_v31 = vsel %vm4773_vm3, 1.0, %v4908_v21  ;;  %vm4781_vm12 = vcmp.eq.s32.totalorder %v3564_v38, %v2858_v15  ;;  %vm4782_vm3 = vcmp.eq.s32.totalorder %v3567_v0, %v2858_v15 }
 0x113   : > { %v3616_v19 = vsub.f32 %v363_v31, %v363_v31  ;;  %v364_v29 = vsel %vm4781_vm12, 1.0, %v4908_v21  ;;  %v365_v56 = vsel %vm4782_vm3, 1.0, %v4908_v21  ;;  %vm4791_vm3 = vcmp.eq.s32.totalorder %v3623_v12, %v2858_v15 }
 0x114   : > { %463 = vmatmul.mubr.f32.vlgmr.msra.gmra.mrb[0].mxu0 %v462_v42  ;;  %v3614_v42 = vadd.s32 336, %v2842_v1  ;;  %v3667_v31 = vadd.s32 488, %v2842_v1  ;;  %v3670_v0 = vsub.f32 %v364_v29, %v364_v29  ;;  %v3672_v38 = vsub.f32 %v365_v56, %v365_v56 }
 0x115   : > { %2473 = vmatpush3.bf16.msra.mxu0 %v2472_v62  ;;  %2513 = vmatpush3.bf16.msk.msra.mxu1 %vm3040_vm2, %v4914_v8  ;;  %v3618_v62 = vsub.f32 %v380_v9, %v380_v9  ;;  %v3633_v9 = vsub.f32 %v381_v53, %v381_v53  ;;  %v3688_v29 = vadd.s32 360, %v2842_v1  ;;  %v4982_v56 = vpack.c.bf16 %v3044_v43, %v3031_v41 }
 0x116   : > { %4968 = vst [vmem:[#allocation20_spill] sm:$0xff] %v3614_v42  ;;  %766 = vmatprep.mubr.f32.mxu0 %v453_v13  ;;  %2475 = vmatprep.subr.bf16.mxu0 %v2474_v48  ;;  %v4974_v13 = vld [vmem:[#allocation26_spill] sm:$0xff]  ;;  %vm4788_vm12 = vcmp.eq.s32.totalorder %v3614_v42, %v2858_v15  ;;  %4977 = vst [vmem:[#allocation23_spill] sm:$0xff] %v3667_v31  ;;  %v3706_v42 = vadd.s32 504, %v2842_v1  ;;  %v3717_v12 = vadd.s32 368, %v2842_v1  ;;  %v4991_v48 = vand.u32 4294901760, %v3595_v55 }
 0x117   : > { %2515 = vmatprep.subr.msk.bf16.mxu1 %vm3061_vm4, %v4914_v8  ;;  %4978 = vst [vmem:[#allocation24_spill] sm:$0xff] %v3672_v38  ;;  %v366_v53 = vsel %vm4788_vm12, 1.0, %v4908_v21  ;;  %4980 = vst [vmem:[#allocation26_spill] sm:$0xff] %v3685_v3  ;;  %vm4806_vm12 = vcmp.eq.s32.totalorder %v3657_v37, %v2858_v15  ;;  %v4995_v41 = vand.u32 4294901760, %v3616_v19  ;;  %vm5001_vm6 = vcmp.eq.s32.totalorder %v3667_v31, %v2858_v15 }
 0x118   : > { %4981 = vst [vmem:[#allocation45_spill] sm:$0xff] %v3688_v29  ;;  %4985 = vst [vmem:[#allocation47_spill] sm:$0xff] %v3706_v42  ;;  %v3738_v14 = vsub.f32 %v366_v53, %v366_v53  ;;  %v5112_v10 = vand.u32 4294901760, %v3595_v55 }
 0x119   : > { %2477 = vmatpush3.bf16.msra.mxu0 %v2476_v54  ;;  %2517 = vmatpush3.bf16.msk.msra.mxu1 %vm3089_vm7, %v4914_v8  ;;  %v3678_v54 = vsub.f32 %v382_v20, %v382_v20  ;;  %v367_v20 = vsel %vm4791_vm3, 1.0, %v4908_v21  ;;  %4988 = vst [vmem:[#allocation48_spill] sm:$0xff] %v3717_v12  ;;  %vm5000_vm3 = vnez %v4928_v51 }
 0x11a   : > { %2479 = vmatprep.subr.bf16.mxu0 %v2478_v11  ;;  %2519 = vmatprep.subr.msk.bf16.mxu1 %vm3342_vm5, %v4914_v8  ;;  %v383_v11 = vsel %vm4787_vm1, 1.0, %v4908_v21  ;;  %vm4983_vm1 = vnez %v4916_v45  ;;  %v4990_v45 = vand.u32 4294901760, %v3583_v27  ;;  %4997 = vst [vmem:[#allocation53_spill] sm:$0xff] %v3738_v14  ;;  %v3740_v46 = vsub.f32 %v367_v20, %v367_v20 }
 0x11b   : > { %4979 = vst [vmem:[#allocation25_spill] sm:$0xff] %v3678_v54  ;;  %v5005_v20 = vand.u32 4294901760, %v3633_v9 }
 0x11c   : > { %v3726_v43 = vpack.c.bf16 %v4991_v48, %v4990_v45  ;;  %4998 = vst [vmem:[#allocation54_spill] sm:$0xff] %v3740_v46  ;;  %v4999_v45 = vpack.c.bf16 %v3104_v36, %v3099_v34  ;;  %v5002_v48 = vpack.c.bf16 %v4963_v35, %v4962_v30 }
 0x11d   : > { %2481 = vmatpush3.bf16.msra.mxu0 %v4982_v56  ;;  %2521 = vmatpush3.bf16.msk.msra.mxu1 %vm4983_vm1, %v4914_v8  ;;  %v4986_v56 = vpack.c.bf16 %v3068_v59, %v3066_v58  ;;  %v3730_v59 = vsub.f32 %v383_v11, %v383_v11  ;;  %v4994_v58 = vand.u32 4294901760, %v3607_v18  ;;  %v5004_v11 = vand.u32 4294901760, %v3618_v62 }
 0x11e   : > { %2523 = vmatprep.subr.msk.bf16.mxu1 %vm4987_vm8, %v4914_v8  ;;  %4992 = vst [vmem:[#allocation50_spill] sm:$0xff] %v3726_v43  ;;  %vm5007_vm8 = vcmp.eq.s32.totalorder %v3685_v3, %v2858_v15  ;;  %v5026_v3 = vand.u32 4294901760, %v3740_v46 }
 0x11f   : > { %2483 = vmatprep.subr.bf16.mxu0 %v4986_v56  ;;  %v4809_v56 = vand.u32 4294901760, %v3670_v0  ;;  %4993 = vst [vmem:[#allocation51_spill] sm:$0xff] %v3730_v59  ;;  %v3736_v23 = vpack.c.bf16 %v4995_v41, %v4994_v58  ;;  %v384_v41 = vsel %vm4806_vm12, 1.0, %v4908_v21  ;;  %v385_v58 = vsel %vm5001_vm6, 1.0, %v4908_v21 }
 0x120   : > { %vm4840_vm6 = vcmp.eq.s32.totalorder %v3720_v28, %v2858_v15  ;;  %v368_v47 = vsel %vm5007_vm8, 1.0, %v4908_v21  ;;  %vm5008_vm12 = vcmp.eq.s32.totalorder %v3688_v29, %v2858_v15  ;;  %vm5013_vm8 = vcmp.eq.s32.totalorder %v3706_v42, %v2858_v15 }
 0x121   : > { %4996 = vst [vmem:[#allocation52_spill] sm:$0xff] %v3736_v23  ;;  %2485 = vmatpush3.bf16.msra.mxu0 %v4999_v45  ;;  %2525 = vmatpush3.bf16.msk.msra.mxu1 %vm5000_vm3, %v4914_v8  ;;  %vm5003_vm3 = vnez %v4932_v22  ;;  %v3779_v45 = vpack.c.bf16 %v5005_v20, %v5004_v11  ;;  %v369_v53 = vsel %vm5008_vm12, 1.0, %v4908_v21  ;;  %v5009_v23 = vand.u32 4294901760, %v3672_v38 }
 0x122   : > { %2487 = vmatprep.subr.bf16.mxu0 %v5002_v48  ;;  %2527 = vmatprep.subr.msk.bf16.mxu1 %vm5003_vm3, %v4914_v8  ;;  %v3796_v11 = vsub.f32 %v384_v41, %v384_v41  ;;  %v3798_v20 = vsub.f32 %v385_v58, %v385_v58  ;;  %v386_v48 = vsel %vm4808_vm14, 1.0, %v4908_v21  ;;  %v5014_v29 = vpack.c.bf16 %v4965_v26, %v4964_v16 }
 0x123   : > { %5006 = vst [vmem:[#allocation55_spill] sm:$0xff] %v3779_v45  ;;  %v3794_v43 = vpack.c.bf16 %v5009_v23, %v4809_v56  ;;  %v387_v45 = vsel %vm5013_vm8, 1.0, %v4908_v21  ;;  %vm5015_vm12 = vnez %v4936_v17  ;;  %vm5016_vm14 = vcmp.eq.s32.totalorder %v3717_v12, %v2858_v15 }
 0x124   : > { %5011 = vst [vmem:[#allocation57_spill] sm:$0xff] %v3796_v11  ;;  %5012 = vst [vmem:[#allocation58_spill] sm:$0xff] %v3798_v20  ;;  %v370_v58 = vsel %vm5016_vm14, 1.0, %v4908_v21  ;;  %v371_v56 = vsel %vm4840_vm6, 1.0, %v4908_v21  ;;  %v3830_v23 = vsub.f32 %v368_v47, %v368_v47  ;;  %v3832_v41 = vsub.f32 %v369_v53, %v369_v53 }
 0x125   : > { %5010 = vst [vmem:[#allocation56_spill] sm:$0xff] %v3794_v43  ;;  %2489 = vmatpush3.bf16.msra.mxu0 %v5014_v29  ;;  %2529 = vmatpush3.bf16.msk.msra.mxu1 %vm5015_vm12, %v4914_v8  ;;  %v5017_v29 = vpack.c.bf16 %v4972_v39, %v4971_v50  ;;  %v5020_v43 = vand.u32 4294901760, %v3678_v54  ;;  %v5021_v12 = vand.u32 4294901760, %v3730_v59  ;;  %v3840_v28 = vsub.f32 %v386_v48, %v386_v48 }
 0x126   : > { %2531 = vmatprep.subr.msk.bf16.mxu1 %vm3448_vm15, %v4914_v8  ;;  %5018 = vst [vmem:[#allocation59_spill] sm:$0xff] %v3830_v23  ;;  %5019 = vst [vmem:[#allocation60_spill] sm:$0xff] %v3832_v41  ;;  %v3842_v49 = vsub.f32 %v387_v45, %v387_v45  ;;  %v4820_v47 = vand.u32 4294901760, %v3796_v11  ;;  %v4819_v53 = vand.u32 4294901760, %v3798_v20  ;;  %v3852_v37 = vsub.f32 %v370_v58, %v370_v58  ;;  %v5076_v20 = vld [vmem:[#allocation16_spill] sm:$0xff] }
 0x127   : > { %2491 = vmatprep.subr.bf16.mxu0 %v5017_v29  ;;  %v3838_v42 = vpack.c.bf16 %v5021_v12, %v5020_v43  ;;  %5023 = vst [vmem:[#allocation62_spill] sm:$0xff] %v3840_v28  ;;  %v5025_v29 = vand.u32 4294901760, %v3738_v14  ;;  %v3854_v54 = vsub.f32 %v371_v56, %v371_v56  ;;  %v5030_v43 = vpack.c.bf16 %v4974_v13, %v4973_v40 }
 0x128   : > { %5024 = vst [vmem:[#allocation63_spill] sm:$0xff] %v3842_v49  ;;  %5028 = vst [vmem:[#allocation65_spill] sm:$0xff] %v3852_v37  ;;  %vm5032_vm14 = vnez %v4872_v52  ;;  %v4821_v12 = vand.u32 4294901760, %v3830_v23  ;;  %v3874_v45 = vpack.c.bf16 %v4819_v53, %v4820_v47  ;;  %v3877_v48 = vadd.s32 384, %v2842_v1 }
 0x129   : > { %5022 = vst [vmem:[#allocation61_spill] sm:$0xff] %v3838_v42  ;;  %v3848_v31 = vpack.c.bf16 %v5026_v3, %v5025_v29  ;;  %5029 = vst [vmem:[#allocation66_spill] sm:$0xff] %v3854_v54  ;;  %2493 = vmatpush3.bf16.msra.mxu0 %v5030_v43  ;;  %2533 = vmatpush3.bf16.msk.msra.mxu1 %vm3463_vm11, %v4914_v8  ;;  %v5031_v3 = vpack.c.bf16 %v3264_v7, %v3262_v2  ;;  %v3880_v58 = vadd.s32 392, %v2842_v1 }
 0x12a   : > { %2567 = vmatprep.subr.msk.bf16.mxu1 %vm5032_vm14, %v4914_v8  ;;  %5033 = vst [vmem:[#allocation67_spill] sm:$0xff] %v3874_v45  ;;  %v4823_v29 = vand.u32 4294901760, %v3840_v28  ;;  %v4822_v52 = vand.u32 4294901760, %v3842_v49  ;;  %v5034_v43 = vand.u32 4294901760, %v3506_v5  ;;  %v5035_v53 = vand.u32 4294901760, %v3832_v41 }
 0x12b   : > { %5027 = vst [vmem:[#allocation64_spill] sm:$0xff] %v3848_v31  ;;  %2495 = vmatprep.subr.bf16.mxu0 %v5031_v3  ;;  %v5037_v45 = vpack.c.bf16 %v3276_v44, %v3274_v63  ;;  %v3918_v3 = vadd.s32 264, %v2842_v1  ;;  %vm309_vm8 = vcmp.eq.s32.totalorder %v3880_v58, %v2858_v15  ;;  %v5054_v31 = vld [vmem:[#allocation4_spill] sm:$0xff]  ;;  %v3981_v28 = vadd.s32 280, %v2842_v1 }
 0x12c   : > { %845 = vmatmul.mubr.f32.vlgmr.msra.gmra.mrb[2].mxu1 %v5034_v43  ;;  %v3892_v47 = vpack.c.bf16 %v5035_v53, %v4821_v12  ;;  %v3904_v43 = vpack.c.bf16 %v4822_v52, %v4823_v29  ;;  %v5039_v53 = vpack.c.bf16 %v3320_v32, %v3318_v33  ;;  %v5040_v12 = vand.u32 4294901760, %v2883_v24 }
 0x12d   : > { %2497 = vmatpush3.bf16.msra.mxu0 %v5037_v45  ;;  %2569 = vmatpush3.bf16.msk.msra.mxu1 %vm2958_vm9, %v4914_v8  ;;  %v5041_v45 = vand.u32 4294901760, %v2885_v25  ;;  %v5042_v52 = vand.u32 4294901760, %v3852_v37  ;;  %v5043_v29 = vand.u32 4294901760, %v3854_v54  ;;  %vm308_vm9 = vcmp.eq.s32.totalorder %v3877_v48, %v2858_v15  ;;  %v5056_v54 = vld [vmem:[#allocation5_spill] sm:$0xff] }
 0x12e   : > { %5036 = vst [vmem:[#allocation68_spill] sm:$0xff] %v3892_v47  ;;  %5038 = vst [vmem:[#allocation69_spill] sm:$0xff] %v3904_v43  ;;  %1051 = vmatprep.mubr.f32.mxu1 %v3486_v6  ;;  %2499 = vmatprep.subr.bf16.mxu0 %v5039_v53  ;;  %v3934_v24 = vadd.s32 400, %v2842_v1  ;;  %v3937_v25 = vadd.s32 408, %v2842_v1  ;;  %v5051_v53 = vand.u32 4294901760, %v5050_v61  ;;  %v5055_v42 = vand.u32 4294901760, %v5054_v31 }
 0x12f   : > { %v2534_v56 = vpack.c.bf16 %v5041_v45, %v5040_v12  ;;  %v3924_v43 = vpack.c.bf16 %v5043_v29, %v5042_v52  ;;  %2571 = vmatprep.subr.msk.bf16.mxu1 %vm2967_vm10, %v4914_v8  ;;  %v5047_v12 = vld [vmem:[#allocation29_spill] sm:$0xff]  ;;  %v5052_v45 = vld [vmem:[#allocation3_spill] sm:$0xff]  ;;  %v5057_v37 = vand.u32 4294901760, %v5056_v54  ;;  %v3967_v31 = vld [vmem:[%s4676_s1] ss:$0 sm:$0xff]  ;;  %v3988_v54 = vadd.s32 424, %v2842_v1 }
 0x130   : > { %5045 = vst [vmem:[#allocation71_spill] sm:$0xff] %v3934_v24  ;;  %5046 = vst [vmem:[#allocation72_spill] sm:$0xff] %v3937_v25  ;;  %v5048_v29 = vpack.c.bf16 %v3367_v4, %v5047_v12  ;;  %vm292_vm10 = vcmp.eq.s32.totalorder %v3915_v57, %v3967_v31  ;;  %vm4845_vm14 = vcmp.eq.s32.totalorder %v3937_v25, %v3967_v31  ;;  %v5064_v61 = vld [vmem:[#allocation7_spill] sm:$0xff]  ;;  %v5077_v25 = vand.u32 4294901760, %v5076_v20 }
 0x131   : > { %5044 = vst [vmem:[#allocation70_spill] sm:$0xff] %v3924_v43  ;;  %2573 = vmatpush3.bf16.msk.msra.mxu1 %vm2998_vm13, %v4914_v8  ;;  %v5053_v43 = vand.u32 4294901760, %v5052_v45  ;;  %v2538_v49 = vpack.c.bf16 %v5057_v37, %v5055_v42  ;;  %vm293_vm13 = vcmp.eq.s32.totalorder %v3918_v3, %v3967_v31  ;;  %v3978_v37 = vadd.s32 272, %v2842_v1  ;;  %5059 = vst [vmem:[#allocation29_spill] sm:$0xff] %v3981_v28 }
 0x132   : > { %2501 = vmatpush3.bf16.msra.mxu0 %v5048_v29  ;;  %2575 = vmatprep.subr.msk.bf16.mxu1 %vm3010_vm0, %v4914_v8  ;;  %v372_v29 = vsel %vm308_vm9, 1.0, %v4908_v21  ;;  %vm310_vm0 = vcmp.eq.s32.totalorder %v3934_v24, %v3967_v31  ;;  %v3985_v42 = vadd.s32 416, %v2842_v1  ;;  %5061 = vst [vmem:[#allocation2_spill] sm:$0xff] %v3988_v54  ;;  %vm4852_vm6 = vcmp.eq.s32.totalorder %v3981_v28, %v3967_v31  ;;  %v5078_v24 = vld [vmem:[#allocation17_spill] sm:$0xff] }
 0x133   : > { %v2536_v47 = vpack.c.bf16 %v5053_v43, %v5051_v53  ;;  %2535 = vmatprep.subr.bf16.mxu0 %v2534_v56  ;;  %v373_v43 = vsel %vm309_vm8, 1.0, %v4908_v21  ;;  %v5062_v56 = vld [vmem:[#allocation6_spill] sm:$0xff]  ;;  %v5065_v53 = vand.u32 4294901760, %v5064_v61  ;;  %v3995_v41 = vsub.f32 %v372_v29, %v372_v29 }
 0x134   : > { %5060 = vst [vmem:[#allocation8_spill] sm:$0xff] %v3985_v42  ;;  %v5063_v52 = vand.u32 4294901760, %v5062_v56  ;;  %v3997_v23 = vsub.f32 %v373_v43, %v373_v43  ;;  %v5069_v56 = vld [vmem:[#allocation11_spill] sm:$0xff]  ;;  %v357_v29 = vsel %vm293_vm13, 1.0, %v4908_v21  ;;  %v374_v43 = vsel %vm310_vm0, 1.0, %v4908_v21 }
 0x135   : > { %769 = vmatmul.mubr.f32.vlgmr.msra.gmra.mrb[2].mxu0 %v3506_v5  ;;  %v356_v5 = vsel %vm292_vm10, 1.0, %v4908_v21  ;;  %2577 = vmatpush3.bf16.msk.msra.mxu1 %vm3040_vm2, %v4914_v8  ;;  %v5070_v11 = vand.u32 4294901760, %v5069_v56  ;;  %vm294_vm2 = vcmp.eq.s32.totalorder %v3978_v37, %v3967_v31  ;;  %v5079_v59 = vand.u32 4294901760, %v5078_v24  ;;  %v5247_v37 = vld [vmem:[#allocation61_spill] sm:$0xff] }
 0x136   : > { %2537 = vmatpush3.bf16.msra.mxu0 %v2536_v47  ;;  %979 = vmatprep.mubr.f32.mxu0 %v3486_v6  ;;  %v2540_v45 = vpack.c.bf16 %v5065_v53, %v5063_v52  ;;  %v5067_v6 = vld [vmem:[#allocation10_spill] sm:$0xff]  ;;  %v4033_v52 = vadd.s32 296, %v2842_v1  ;;  %v5072_v53 = vld [vmem:[#allocation12_spill] sm:$0xff]  ;;  %v4039_v14 = vsub.f32 %v356_v5, %v356_v5  ;;  %v4856_v38 = vand.u32 4294901760, %v3995_v41 }
 0x137   : > { %2539 = vmatprep.subr.bf16.mxu0 %v2538_v49  ;;  %v5068_v47 = vand.u32 4294901760, %v5067_v6  ;;  %v375_v49 = vsel %vm4845_vm14, 1.0, %v4908_v21  ;;  %2579 = vmatprep.subr.msk.bf16.mxu1 %vm3061_vm4, %v4914_v8  ;;  %v5073_v6 = vand.u32 4294901760, %v5072_v53  ;;  %vm312_vm4 = vcmp.eq.s32.totalorder %v3985_v42, %v3967_v31  ;;  %v5132_v3 = vld [vmem:[#allocation72_spill] sm:$0xff] }
 0x138   : > { %vm313_vm14 = vcmp.eq.s32.totalorder %v3988_v54, %v3967_v31  ;;  %v359_v24 = vsel %vm4852_vm6, 1.0, %v4908_v21  ;;  %vm297_vm6 = vcmp.eq.s32.totalorder %v4033_v52, %v3967_v31  ;;  %v5084_v20 = vand.u32 4294901760, %v4962_v30 }
 0x139   : > { %v2542_v61 = vpack.c.bf16 %v5070_v11, %v5068_v47  ;;  %v4030_v11 = vadd.s32 288, %v2842_v1  ;;  %v5074_v47 = vld [vmem:[#allocation14_spill] sm:$0xff]  ;;  %v2546_v1 = vpack.c.bf16 %v5079_v59, %v5077_v25  ;;  %2581 = vmatpush3.bf16.msk.msra.mxu1 %vm3089_vm7, %v4914_v8  ;;  %v358_v59 = vsel %vm294_vm2, 1.0, %v4908_v21 }
 0x13a   : > { %v5075_v56 = vand.u32 4294901760, %v5074_v47  ;;  %2541 = vmatpush3.bf16.msra.mxu0 %v2540_v45  ;;  %v4051_v47 = vsub.f32 %v357_v29, %v357_v29  ;;  %2583 = vmatprep.subr.msk.bf16.mxu1 %vm3342_vm5, %v4914_v8  ;;  %v376_v45 = vsel %vm312_vm4, 1.0, %v4908_v21  ;;  %v5082_v29 = vand.u32 4294901760, %v3099_v34 }
 0x13b   : > { %2543 = vmatprep.subr.bf16.mxu0 %v2542_v61  ;;  %v377_v61 = vsel %vm313_vm14, 1.0, %v4908_v21  ;;  %vm296_vm7 = vcmp.eq.s32.totalorder %v4030_v11, %v3967_v31  ;;  %v5085_v5 = vand.u32 4294901760, %v4963_v35  ;;  %v4857_v53 = vand.u32 4294901760, %v4039_v14 }
 0x13c   : > { %v2544_v46 = vpack.c.bf16 %v5075_v56, %v5073_v6  ;;  %v4056_v6 = vsub.f32 %v374_v43, %v374_v43  ;;  %v4058_v56 = vsub.f32 %v375_v49, %v375_v49  ;;  %v5083_v43 = vand.u32 4294901760, %v3104_v36 }
 0x13d   : > { %v2550_v25 = vpack.c.bf16 %v5085_v5, %v5084_v20  ;;  %v1237_v54 = vsub.f32 %v3995_v41, %v4856_v38  ;;  %v4096_v28 = vsub.f32 %v358_v59, %v358_v59  ;;  %v4098_v34 = vsub.f32 %v359_v24, %v359_v24  ;;  %2585 = vmatpush3.bf16.msk.msra.mxu1 %vm4983_vm1, %v4914_v8  ;;  %v5087_v24 = vld [vmem:[#allocation34_spill] sm:$0xff] }
 0x13e   : > { %v2548_v49 = vpack.c.bf16 %v5083_v43, %v5082_v29  ;;  %2545 = vmatpush3.bf16.msra.mxu0 %v2544_v46  ;;  %v4103_v30 = vsub.f32 %v376_v45, %v376_v45  ;;  %v4105_v35 = vsub.f32 %v377_v61, %v377_v61  ;;  %v360_v46 = vsel %vm296_vm7, 1.0, %v4908_v21  ;;  %v5088_v29 = vld [vmem:[#allocation32_spill] sm:$0xff]  ;;  %v5089_v20 = vld [vmem:[#allocation30_spill] sm:$0xff] }
 0x13f   : > { %2547 = vmatprep.subr.bf16.mxu0 %v2546_v1  ;;  %v361_v59 = vsel %vm297_vm6, 1.0, %v4908_v21  ;;  %v189_v43 = vmax.f32 %v5088_v29, %v5087_v24  ;;  %vm5090_vm5 = vnez %v5089_v20  ;;  %v5091_v1 = vand.u32 4294901760, %v3997_v23 }
 0x140   : > { %2587 = vmatprep.subr.msk.bf16.mxu1 %vm5090_vm5, %v4914_v8  ;;  %v5092_v36 = vand.u32 4294901760, %v4964_v16  ;;  %v5093_v38 = vand.u32 4294901760, %v4965_v26  ;;  %v5094_v42 = vand.u32 4294901760, %v4971_v50  ;;  %v5095_v24 = vand.u32 4294901760, %v4972_v39 }
 0x141   : > { %v1243_v45 = vsub.f32 %v3997_v23, %v5091_v1  ;;  %v1141_v20 = vsub.f32 %v4039_v14, %v4857_v53  ;;  %v5096_v1 = vand.u32 4294901760, %v4051_v47  ;;  %v4860_v5 = vand.u32 4294901760, %v4096_v28 }
 0x142   : > { %v2552_v21 = vpack.c.bf16 %v5093_v38, %v5092_v36  ;;  %v2554_v29 = vpack.c.bf16 %v5095_v24, %v5094_v42  ;;  %2549 = vmatpush3.bf16.msra.mxu0 %v2548_v49  ;;  %v4140_v16 = vsub.f32 %v360_v46, %v360_v46  ;;  %v4142_v26 = vsub.f32 %v361_v59, %v361_v59 }
 0x143   : > { %v1147_v61 = vsub.f32 %v4051_v47, %v5096_v1  ;;  %vm5097_vm1 = vnez %v4928_v51  ;;  %2551 = vmatprep.subr.bf16.mxu0 %v2550_v25  ;;  %v1238_v38 = vand.u32 4294901760, %v1237_v54  ;;  %v4150_v49 = vand.u32 4294901760, %v189_v43 }
 0x144   : > { %2589 = vmatpush3.bf16.msk.msra.mxu1 %vm5097_vm1, %v4914_v8  ;;  %v1244_v46 = vand.u32 4294901760, %v1243_v45  ;;  %v5098_v59 = vand.u32 4294901760, %v4056_v6  ;;  %v5099_v25 = vand.u32 4294901760, %v4058_v56  ;;  %v5100_v36 = vand.u32 4294901760, %v4973_v40 }
 0x145   : > { %2591 = vmatprep.subr.msk.bf16.mxu1 %vm5003_vm3, %v4914_v8  ;;  %v5101_v24 = vand.u32 4294901760, %v4974_v13  ;;  %v5102_v53 = vand.u32 4294901760, %v3262_v2  ;;  %v5103_v42 = vand.u32 4294901760, %v3264_v7  ;;  %v1142_v50 = vand.u32 4294901760, %v1141_v20 }
 0x146   : > { %v1249_v51 = vsub.f32 %v4056_v6, %v5098_v59  ;;  %v1255_v54 = vsub.f32 %v4058_v56, %v5099_v25  ;;  %2553 = vmatpush3.bf16.msra.mxu0 %v2552_v21  ;;  %v1148_v45 = vand.u32 4294901760, %v1147_v61  ;;  %v1153_v59 = vsub.f32 %v4096_v28, %v4860_v5 }
 0x147   : > { %v2556_v1 = vpack.c.bf16 %v5101_v24, %v5100_v36  ;;  %v2558_v22 = vpack.c.bf16 %v5103_v42, %v5102_v53  ;;  %v4859_v39 = vand.u32 4294901760, %v4140_v16  ;;  %v4858_v25 = vand.u32 4294901760, %v4142_v26  ;;  %2555 = vmatprep.subr.bf16.mxu0 %v2554_v29 }
 0x148   : > { %2593 = vmatpush3.bf16.msk.msra.mxu1 %vm5015_vm12, %v4914_v8  ;;  %v5104_v40 = vand.u32 4294901760, %v4098_v34  ;;  %v5105_v7 = vand.u32 4294901760, %v4103_v30  ;;  %v5106_v53 = vand.u32 4294901760, %v4105_v35  ;;  %v4187_v21 = vsub.f32 %v189_v43, %v4150_v49 }
 0x149   : > { %2595 = vmatprep.subr.msk.bf16.mxu1 %vm3448_vm15, %v4914_v8  ;;  %v2630_v17 = vpack.c.bf16 %v1244_v46, %v1238_v38  ;;  %v1250_v29 = vand.u32 4294901760, %v1249_v51  ;;  %v1256_v20 = vand.u32 4294901760, %v1255_v54  ;;  %v5107_v42 = vand.u32 4294901760, %v3274_v63  ;;  %vm4259_vm15 = vmpackc.low %vm293_vm13, %vm292_vm10 }
 0x14a   : > { %v1159_v2 = vsub.f32 %v4098_v34, %v5104_v40  ;;  %v1261_v13 = vsub.f32 %v4103_v30, %v5105_v7  ;;  %v1267_v61 = vsub.f32 %v4105_v35, %v5106_v53  ;;  %v5108_v36 = vand.u32 4294901760, %v3276_v44  ;;  %2557 = vmatpush3.bf16.msra.mxu0 %v2556_v1  ;;  %vm4311_vm10 = vmpackc.low %vm313_vm14, %vm312_vm4 }
 0x14b   : > { %v2632_v40 = vpack.c.bf16 %v1148_v45, %v1142_v50  ;;  %v1154_v7 = vand.u32 4294901760, %v1153_v59  ;;  %v1165_v43 = vsub.f32 %v4140_v16, %v4859_v39  ;;  %v1171_v60 = vsub.f32 %v4142_v26, %v4858_v25  ;;  %2559 = vmatprep.subr.bf16.mxu0 %v2558_v22  ;;  %vm4336_vm13 = vmpackc.low %vm297_vm6, %vm296_vm7  ;;  %v5180_v25 = vld [vmem:[#allocation40_spill] sm:$0xff] }
 0x14c   : > { %v2560_v24 = vpack.c.bf16 %v5108_v36, %v5107_v42  ;;  %2597 = vmatpush3.bf16.msk.msra.mxu1 %vm3463_vm11, %v4914_v8  ;;  %v1160_v63 = vand.u32 4294901760, %v1159_v2  ;;  %v1262_v38 = vand.u32 4294901760, %v1261_v13  ;;  %v1268_v44 = vand.u32 4294901760, %v1267_v61  ;;  %v5115_v61 = vld [vmem:[#allocation36_spill] sm:$0xff]  ;;  %vm4234_vm11 = vmpackc.low %vm309_vm8, %vm308_vm9 }
 0x14d   : > { %v5109_v46 = vand.u32 4294901760, %v3583_v27  ;;  %2631 = vmatprep.subr.bf16.mxu1 %v2630_v17  ;;  %v5110_v51 = vand.u32 4294901760, %v3318_v33  ;;  %v5111_v54 = vand.u32 4294901760, %v3320_v32  ;;  %v2634_v45 = vpack.c.bf16 %v1256_v20, %v1250_v29 }
 0x14e   : > { %v1124_v59 = vand.u32 4294901760, %v4187_v21  ;;  %v1279_v22 = vsub.f32 %v3595_v55, %v5112_v10  ;;  %v5113_v2 = vand.u32 4294901760, %v5047_v12  ;;  %v5114_v13 = vand.u32 4294901760, %v3367_v4  ;;  %2561 = vmatpush3.bf16.msra.mxu0 %v2560_v24  ;;  %v5127_v10 = vld [vmem:[#allocation25_spill] sm:$0xff] }
 0x14f   : > { %v1273_v50 = vsub.f32 %v3583_v27, %v5109_v46  ;;  %v2562_v1 = vpack.c.bf16 %v5111_v54, %v5110_v51  ;;  %1053 = vmatmul.mubr.f32.vlgmr.msra.gmra.mrb[4].mxu1 %v5115_v61  ;;  %v1166_v17 = vand.u32 4294901760, %v1165_v43  ;;  %v1172_v33 = vand.u32 4294901760, %v1171_v60  ;;  %v5125_v54 = vld [vmem:[#allocation24_spill] sm:$0xff] }
 0x150   : > { %v2564_v53 = vpack.c.bf16 %v5114_v13, %v5113_v2  ;;  %v5116_v32 = vand.u32 4294901760, %v3607_v18  ;;  %v5117_v20 = vand.u32 4294901760, %v3616_v19  ;;  %2633 = vmatpush3.bf16.msra.mxu1 %v2632_v40  ;;  %1331 = vmatprep.mubr.f32.mxu1 %v4150_v49  ;;  %v2636_v12 = vpack.c.bf16 %v1160_v63, %v1154_v7  ;;  %v5129_v13 = vld [vmem:[#allocation51_spill] sm:$0xff] }
 0x151   : > { %v2638_v36 = vpack.c.bf16 %v1268_v44, %v1262_v38  ;;  %v1274_v4 = vand.u32 4294901760, %v1273_v50  ;;  %2563 = vmatprep.subr.bf16.mxu0 %v2562_v1  ;;  %2635 = vmatprep.subr.bf16.mxu1 %v2634_v45  ;;  %v1125_v40 = vsub.f32 %v4187_v21, %v1124_v59  ;;  %v1280_v43 = vand.u32 4294901760, %v1279_v22 }
 0x152   : > { %v1177_v29 = vsub.f32 %v3607_v18, %v5116_v32  ;;  %v1183_v42 = vsub.f32 %v3616_v19, %v5117_v20  ;;  %v5120_v7 = vand.u32 4294901760, %v3618_v62  ;;  %v5121_v63 = vand.u32 4294901760, %v3633_v9  ;;  %2565 = vmatpush3.bf16.msra.mxu0 %v2564_v53 }
 0x153   : > { %v2640_v38 = vpack.c.bf16 %v1172_v33, %v1166_v17  ;;  %v5122_v46 = vand.u32 4294901760, %v3670_v0  ;;  %2599 = vmatprep.subr.msk.bf16.mxu0 %vm4234_vm11, %v4914_v8  ;;  %v5126_v1 = vand.u32 4294901760, %v5125_v54  ;;  %v5128_v22 = vand.u32 4294901760, %v5127_v10 }
 0x154   : > { %v1285_v60 = vsub.f32 %v3618_v62, %v5120_v7  ;;  %v1291_v48 = vsub.f32 %v3633_v9, %v5121_v63  ;;  %v1178_v58 = vand.u32 4294901760, %v1177_v29  ;;  %v1184_v44 = vand.u32 4294901760, %v1183_v42  ;;  %2637 = vmatpush3.bf16.msra.mxu1 %v2636_v12  ;;  %v5138_v63 = vld [vmem:[#allocation54_spill] sm:$0xff] }
 0x155   : > { %v1189_v50 = vsub.f32 %v3670_v0, %v5122_v46  ;;  %v1195_v45 = vsub.f32 %v5125_v54, %v5126_v1  ;;  %v1297_v2 = vsub.f32 %v5127_v10, %v5128_v22  ;;  %v5130_v53 = vand.u32 4294901760, %v5129_v13  ;;  %2639 = vmatprep.subr.bf16.mxu1 %v2638_v36  ;;  %981 = vmatmul.mubr.f32.vlgmr.msra.gmra.mrb[4].mxu0 %v5115_v61  ;;  %v5136_v36 = vld [vmem:[#allocation53_spill] sm:$0xff] }
 0x156   : > { %v1126_v57 = vand.u32 4294901760, %v1125_v40  ;;  %vm5133_vm3 = vcmp.eq.s32.totalorder %v5132_v3, %v3967_v31  ;;  %v2642_v29 = vpack.c.bf16 %v1280_v43, %v1274_v4  ;;  %v1286_v20 = vand.u32 4294901760, %v1285_v60  ;;  %2601 = vmatpush3.bf16.msk.msra.mxu0 %vm4259_vm15, %v4914_v8  ;;  %v5140_v61 = vld [vmem:[#allocation29_spill] sm:$0xff] }
 0x157   : > { %v1303_v17 = vsub.f32 %v5129_v13, %v5130_v53  ;;  %vm4278_vm12 = vmpackc.low %vm5133_vm3, %vm310_vm0  ;;  %v1292_v42 = vand.u32 4294901760, %v1291_v48  ;;  %v2644_v12 = vpack.c.bf16 %v1184_v44, %v1178_v58  ;;  %v5137_v40 = vand.u32 4294901760, %v5136_v36  ;;  %v5148_v53 = vld [vmem:[#allocation57_spill] sm:$0xff] }
 0x158   : > { %1127 = vmatprep.mubr.f32.mxu0 %v1126_v57  ;;  %v5139_v46 = vand.u32 4294901760, %v5138_v63  ;;  %2641 = vmatpush3.bf16.msra.mxu1 %v2640_v38  ;;  %vm5141_vm9 = vcmp.eq.s32.totalorder %v5140_v61, %v3967_v31  ;;  %v1190_v43 = vand.u32 4294901760, %v1189_v50  ;;  %v1196_v60 = vand.u32 4294901760, %v1195_v45  ;;  %v5150_v50 = vld [vmem:[#allocation58_spill] sm:$0xff]  ;;  %v5158_v38 = vld [vmem:[#allocation35_spill] sm:$0xff]  ;;  %v5160_v44 = vld [vmem:[#allocation37_spill] sm:$0xff] }
 0x159   : > { %v1201_v7 = vsub.f32 %v5136_v36, %v5137_v40  ;;  %2603 = vmatprep.subr.msk.bf16.mxu0 %vm4278_vm12, %v4914_v8  ;;  %vm4301_vm8 = vmpackc.low %vm5141_vm9, %vm294_vm2  ;;  %v1298_v48 = vand.u32 4294901760, %v1297_v2  ;;  %v1304_v58 = vand.u32 4294901760, %v1303_v17  ;;  %2643 = vmatprep.subr.bf16.mxu1 %v2642_v29  ;;  %v2646_v22 = vpack.c.bf16 %v1292_v42, %v1286_v20  ;;  %v5152_v29 = vld [vmem:[#allocation59_spill] sm:$0xff]  ;;  %v5251_v20 = vld [vmem:[#allocation69_spill] sm:$0xff] }
 0x15a   : > { %v1207_v1 = vsub.f32 %v5138_v63, %v5139_v46  ;;  %v5149_v57 = vand.u32 4294901760, %v5148_v53  ;;  %v5151_v45 = vand.u32 4294901760, %v5150_v50  ;;  %2605 = vmatpush3.bf16.msk.msra.mxu0 %vm4301_vm8, %v4914_v8  ;;  %v5153_v40 = vand.u32 4294901760, %v5152_v29 }
 0x15b   : > { %v1202_v17 = vand.u32 4294901760, %v1201_v7  ;;  %2607 = vmatprep.subr.msk.bf16.mxu0 %vm4311_vm10, %v4914_v8  ;;  %v2648_v42 = vpack.c.bf16 %v1196_v60, %v1190_v43  ;;  %v2650_v7 = vpack.c.bf16 %v1304_v58, %v1298_v48  ;;  %vm5159_vm0 = vcmp.eq.s32.totalorder %v5158_v38, %v2858_v15  ;;  %v5166_v48 = vld [vmem:[#allocation63_spill] sm:$0xff] }
 0x15c   : > { %v1309_v33 = vsub.f32 %v5148_v53, %v5149_v57  ;;  %v1315_v2 = vsub.f32 %v5150_v50, %v5151_v45  ;;  %v1208_v3 = vand.u32 4294901760, %v1207_v1  ;;  %v1213_v46 = vsub.f32 %v5152_v29, %v5153_v40  ;;  %2645 = vmatpush3.bf16.msra.mxu1 %v2644_v12  ;;  %v5156_v1 = vld [vmem:[#allocation60_spill] sm:$0xff]  ;;  %v5164_v57 = vld [vmem:[#allocation62_spill] sm:$0xff]  ;;  %v5169_v38 = vld [vmem:[#allocation31_spill] sm:$0xff] }
 0x15d   : > { %v5157_v61 = vand.u32 4294901760, %v5156_v1  ;;  %2647 = vmatprep.subr.bf16.mxu1 %v2646_v22  ;;  %vm5161_vm14 = vcmp.eq.s32.totalorder %v5160_v44, %v2858_v15  ;;  %v5165_v43 = vand.u32 4294901760, %v5164_v57  ;;  %v5167_v58 = vand.u32 4294901760, %v5166_v48 }
 0x15e   : > { %vm4349_vm2 = vmpackc.low %vm5161_vm14, %vm5159_vm0  ;;  %v1310_v31 = vand.u32 4294901760, %v1309_v33  ;;  %v1316_v52 = vand.u32 4294901760, %v1315_v2  ;;  %2609 = vmatpush3.bf16.msk.msra.mxu0 %vm4336_vm13, %v4914_v8  ;;  %v2652_v45 = vpack.c.bf16 %v1208_v3, %v1202_v17  ;;  %v1214_v40 = vand.u32 4294901760, %v1213_v46  ;;  %v5170_v33 = vld [vmem:[#allocation38_spill] sm:$0xff]  ;;  %v5172_v2 = vld [vmem:[#allocation39_spill] sm:$0xff] }
 0x15f   : > { %v1219_v12 = vsub.f32 %v5156_v1, %v5157_v61  ;;  %v1321_v60 = vsub.f32 %v5164_v57, %v5165_v43  ;;  %v1327_v22 = vsub.f32 %v5166_v48, %v5167_v58  ;;  %v5168_v61 = vld [vmem:[#allocation33_spill] sm:$0xff]  ;;  %2611 = vmatprep.subr.msk.bf16.mxu0 %vm4349_vm2, %v4914_v8  ;;  %vm5171_vm6 = vcmp.eq.s32.totalorder %v5170_v33, %v2858_v15 }
 0x160   : > { %v188_v44 = vmax.f32 %v5169_v38, %v5168_v61  ;;  %2649 = vmatpush3.bf16.msra.mxu1 %v2648_v42  ;;  %vm5173_vm4 = vcmp.eq.s32.totalorder %v5172_v2, %v2858_v15  ;;  %v5176_v3 = vld [vmem:[#allocation65_spill] sm:$0xff]  ;;  %v5178_v42 = vld [vmem:[#allocation66_spill] sm:$0xff]  ;;  %vm5181_vm5 = vcmp.eq.s32.totalorder %v5180_v25, %v2858_v15 }
 0x161   : > { %vm4373_vm7 = vmpackc.low %vm5173_vm4, %vm5171_vm6  ;;  %v1220_v17 = vand.u32 4294901760, %v1219_v12  ;;  %v5177_v46 = vand.u32 4294901760, %v5176_v3  ;;  %v5179_v61 = vand.u32 4294901760, %v5178_v42  ;;  %2651 = vmatprep.subr.bf16.mxu1 %v2650_v7  ;;  %v5182_v33 = vld [vmem:[#allocation41_spill] sm:$0xff]  ;;  %v2654_v12 = vpack.c.bf16 %v1316_v52, %v1310_v31  ;;  %v5186_v25 = vld [vmem:[#allocation42_spill] sm:$0xff] }
 0x162   : > { %vm5183_vm1 = vcmp.eq.s32.totalorder %v5182_v33, %v2858_v15  ;;  %v1322_v39 = vand.u32 4294901760, %v1321_v60  ;;  %v1328_v5 = vand.u32 4294901760, %v1327_v22  ;;  %2613 = vmatpush3.bf16.msk.msra.mxu0 %vm4373_vm7, %v4914_v8  ;;  %vm5187_vm9 = vcmp.eq.s32.totalorder %v5186_v25, %v2858_v15  ;;  %v5188_v7 = vld [vmem:[#allocation43_spill] sm:$0xff] }
 0x163   : > { %v1225_v58 = vsub.f32 %v5176_v3, %v5177_v46  ;;  %v1231_v38 = vsub.f32 %v5178_v42, %v5179_v61  ;;  %vm4389_vm3 = vmpackc.low %vm5183_vm1, %vm5181_vm5  ;;  %v4396_v46 = vand.u32 4294901760, %v188_v44  ;;  %vm5189_vm0 = vcmp.eq.s32.totalorder %v5188_v7, %v2858_v15  ;;  %v5192_v61 = vld [vmem:[#allocation44_spill] sm:$0xff] }
 0x164   : > { %2653 = vmatpush3.bf16.msra.mxu1 %v2652_v45  ;;  %2615 = vmatprep.subr.msk.bf16.mxu0 %vm4389_vm3, %v4914_v8  ;;  %vm4407_vm14 = vmpackc.low %vm5189_vm0, %vm5187_vm9  ;;  %v5190_v31 = vmov 0  ;;  %v2656_v52 = vpack.c.bf16 %v1220_v17, %v1214_v40  ;;  %vm5193_vm6 = vcmp.eq.s32.totalorder %v5192_v61, %v2858_v15  ;;  %v5194_v45 = vld [vmem:[#allocation19_spill] sm:$0xff]  ;;  %v2658_v25 = vpack.c.bf16 %v1328_v5, %v1322_v39  ;;  %v5198_v17 = vld [vmem:[#allocation20_spill] sm:$0xff] }
 0x165   : > { %v5191_v31 = vsel %vm4407_vm14, 4294967295, %v5190_v31  ;;  %v1226_v60 = vand.u32 4294901760, %v1225_v58  ;;  %v1232_v22 = vand.u32 4294901760, %v1231_v38  ;;  %2655 = vmatprep.subr.bf16.mxu1 %v2654_v12  ;;  %vm5195_vm4 = vcmp.eq.s32.totalorder %v5194_v45, %v2858_v15  ;;  %v5200_v58 = vld [vmem:[#allocation21_spill] sm:$0xff]  ;;  %v5204_v38 = vld [vmem:[#allocation22_spill] sm:$0xff]  ;;  %v5218_v45 = vld [vmem:[#allocation47_spill] sm:$0xff] }
 0x166   : > { %vm4417_vm5 = vmpackc.low %vm5195_vm4, %vm5193_vm6  ;;  %2617 = vmatpush3.bf16.msk.msra.mxu0 %vm4407_vm14, %v4914_v8  ;;  %v4425_v40 = vsub.f32 %v188_v44, %v4396_v46  ;;  %vm5199_vm1 = vcmp.eq.s32.totalorder %v5198_v17, %v2858_v15  ;;  %vm5201_vm9 = vcmp.eq.s32.totalorder %v5200_v58, %v2858_v15  ;;  %v5202_v5 = vmov 0  ;;  %v5206_v44 = vld [vmem:[#allocation23_spill] sm:$0xff]  ;;  %v5216_v61 = vld [vmem:[#allocation46_spill] sm:$0xff] }
 0x167   : > { %2619 = vmatprep.subr.msk.bf16.mxu0 %vm4417_vm5, %v4914_v8  ;;  %vm4436_vm0 = vmpackc.low %vm5201_vm9, %vm5199_vm1  ;;  %v2660_v39 = vpack.c.bf16 %v1232_v22, %v1226_v60  ;;  %vm5205_vm6 = vcmp.eq.s32.totalorder %v5204_v38, %v2858_v15  ;;  %vm5207_vm4 = vcmp.eq.s32.totalorder %v5206_v44, %v2858_v15  ;;  %v5208_v12 = vmov 0  ;;  %v5212_v60 = vld [vmem:[#allocation45_spill] sm:$0xff]  ;;  %v5222_v17 = vld [vmem:[#allocation48_spill] sm:$0xff] }
 0x168   : > { %2657 = vmatpush3.bf16.msra.mxu1 %v2656_v52  ;;  %v5203_v5 = vsel %vm4436_vm0, 4294967295, %v5202_v5  ;;  %vm4446_vm14 = vmpackc.low %vm5207_vm4, %vm5205_vm6  ;;  %v1130_v7 = vand.u32 4294901760, %v4425_v40  ;;  %v5210_v52 = vld [vmem:[#allocation26_spill] sm:$0xff]  ;;  %vm5213_vm9 = vcmp.eq.s32.totalorder %v5212_v60, %v2858_v15  ;;  %vm5217_vm4 = vcmp.eq.s32.totalorder %v5216_v61, %v2858_v15  ;;  %v5224_v58 = vld [vmem:[#allocation49_spill] sm:$0xff] }
 0x169   : > { %2659 = vmatprep.subr.bf16.mxu1 %v2658_v25  ;;  %v5209_v12 = vsel %vm4446_vm14, 4294967295, %v5208_v12  ;;  %vm5211_vm1 = vcmp.eq.s32.totalorder %v5210_v52, %v2858_v15  ;;  %v2662_v44 = vpack.c.bf16 %v3997_v23, %v3995_v41  ;;  %v2666_v52 = vpack.c.bf16 %v4058_v56, %v4056_v6 }
 0x16a   : > { %2621 = vmatpush3.bf16.msk.msra.mxu0 %vm4436_vm0, %v4914_v8  ;;  %vm4463_vm6 = vmpackc.low %vm5213_vm9, %vm5211_vm1  ;;  %vm5223_vm1 = vcmp.eq.s32.totalorder %v5222_v17, %v2858_v15  ;;  %v1131_v38 = vsub.f32 %v4425_v40, %v1130_v7  ;;  %v2668_v60 = vpack.c.bf16 %v4098_v34, %v4096_v28  ;;  %v2670_v61 = vpack.c.bf16 %v4105_v35, %v4103_v30 }
 0x16b   : > { %2623 = vmatprep.subr.msk.bf16.mxu0 %vm4446_vm14, %v4914_v8  ;;  %vm5219_vm14 = vcmp.eq.s32.totalorder %v5218_v45, %v2858_v15  ;;  %v2672_v45 = vpack.c.bf16 %v4142_v26, %v4140_v16  ;;  %v2676_v17 = vpack.c.bf16 %v3616_v19, %v3607_v18  ;;  %v2684_v18 = vpack.c.bf16 %v5138_v63, %v5136_v36 }
 0x16c   : > { %2661 = vmatpush3.bf16.msra.mxu1 %v2660_v39  ;;  %vm4476_vm0 = vmpackc.low %vm5219_vm14, %vm5217_vm4  ;;  %vm5225_vm14 = vcmp.eq.s32.totalorder %v5224_v58, %v2858_v15  ;;  %v2664_v15 = vpack.c.bf16 %v4051_v47, %v4039_v14  ;;  %vm5228_vm4 = vnez %v5191_v31  ;;  %v2678_v58 = vpack.c.bf16 %v3633_v9, %v3618_v62 }
 0x16d   : > { %2695 = vmatprep.subr.msk.bf16.mxu1 %vm4234_vm11, %v4914_v8  ;;  %vm4495_vm9 = vmpackc.low %vm5225_vm14, %vm5223_vm1  ;;  %vm5229_vm1 = vnez %v5203_v5  ;;  %vm5230_vm14 = vnez %v5209_v12  ;;  %v2688_v19 = vpack.c.bf16 %v5156_v1, %v5152_v29  ;;  %v2690_v62 = vpack.c.bf16 %v5166_v48, %v5164_v57  ;;  %v5250_v29 = vld [vmem:[#allocation68_spill] sm:$0xff]  ;;  %v5252_v1 = vld [vmem:[#allocation70_spill] sm:$0xff] }
 0x16e   : > { %2625 = vmatpush3.bf16.msk.msra.mxu0 %vm4463_vm6, %v4914_v8  ;;  %v2692_v9 = vpack.c.bf16 %v5178_v42, %v5176_v3  ;;  %v5234_v36 = vand.u32 4294901760, %v4051_v47  ;;  %v5238_v47 = vand.u32 4294901760, %v4098_v34  ;;  %v5242_v34 = vand.u32 4294901760, %v4142_v26  ;;  %v5246_v26 = vld [vmem:[#allocation56_spill] sm:$0xff] }
 0x16f   : > { %1333 = vmatmul.mubr.f32.vlgmr.msra.gmra.mrb[6].mxu1 %v4396_v46  ;;  %2627 = vmatprep.subr.msk.bf16.mxu0 %vm4476_vm0, %v4914_v8 }
 0x170   : > { %2697 = vmatpush3.bf16.msk.msra.mxu1 %vm4259_vm15, %v4914_v8  ;;  %1511 = vmatprep.mubr.f32.mxu1 %v1124_v59  ;;  %v1132_v59 = vand.u32 4294901760, %v1131_v38 }
 0x171   : > { %2699 = vmatprep.subr.msk.bf16.mxu1 %vm4278_vm12, %v4914_v8 }
 0x172   : > { %2629 = vmatpush3.bf16.msk.msra.mxu0 %vm4495_vm9, %v4914_v8 }
 0x173   : > { %2663 = vmatprep.subr.bf16.mxu0 %v2662_v44 }
 0x174   : > { %2701 = vmatpush3.bf16.msk.msra.mxu1 %vm4301_vm8, %v4914_v8 }
 0x175   : > { %2703 = vmatprep.subr.msk.bf16.mxu1 %vm4311_vm10, %v4914_v8  ;;  %1133 = vmatmul.mubr.f32.vlgmr.msra.gmra.mrb[6].mxu0 %v1132_v59 }
 0x176   : > { %2665 = vmatpush3.bf16.msra.mxu0 %v2664_v15  ;;  %1436 = vmatprep.mubr.f32.mxu0 %v4187_v21  ;;  %v2674_v21 = vpack.c.bf16 %v3595_v55, %v3583_v27  ;;  %v2680_v55 = vpack.c.bf16 %v5125_v54, %v3670_v0  ;;  %v2682_v27 = vpack.c.bf16 %v5129_v13, %v5127_v10  ;;  %v5231_v54 = vand.u32 4294901760, %v3995_v41 }
 0x177   : > { %2667 = vmatprep.subr.bf16.mxu0 %v2666_v52  ;;  %v2686_v0 = vpack.c.bf16 %v5150_v50, %v5148_v53  ;;  %v5232_v10 = vand.u32 4294901760, %v3997_v23  ;;  %v5233_v13 = vand.u32 4294901760, %v4039_v14  ;;  %v5235_v41 = vand.u32 4294901760, %v4056_v6  ;;  %v5248_v53 = vld [vmem:[#allocation64_spill] sm:$0xff]  ;;  %v5249_v50 = vld [vmem:[#allocation67_spill] sm:$0xff] }
 0x178   : > { %2705 = vmatpush3.bf16.msk.msra.mxu1 %vm4336_vm13, %v4914_v8  ;;  %v5236_v23 = vand.u32 4294901760, %v4058_v56  ;;  %v5237_v14 = vand.u32 4294901760, %v4096_v28  ;;  %v5239_v6 = vand.u32 4294901760, %v4103_v30  ;;  %v5240_v56 = vand.u32 4294901760, %v4105_v35  ;;  %v5243_v30 = vld [vmem:[#allocation50_spill] sm:$0xff]  ;;  %v5244_v35 = vld [vmem:[#allocation52_spill] sm:$0xff] }
 0x179   : > { %2707 = vmatprep.subr.msk.bf16.mxu1 %vm4349_vm2, %v4914_v8  ;;  %v2726_v24 = vpack.c.bf16 %v5232_v10, %v5231_v54  ;;  %v2728_v63 = vpack.c.bf16 %v5234_v36, %v5233_v13  ;;  %v5241_v28 = vand.u32 4294901760, %v4140_v16  ;;  %v5245_v16 = vld [vmem:[#allocation55_spill] sm:$0xff] }
 0x17a   : > { %2669 = vmatpush3.bf16.msra.mxu0 %v2668_v60  ;;  %v2730_v51 = vpack.c.bf16 %v5236_v23, %v5235_v41  ;;  %v2732_v32 = vpack.c.bf16 %v5238_v47, %v5237_v14  ;;  %v2734_v4 = vpack.c.bf16 %v5240_v56, %v5239_v6 }
 0x17b   : > { %2671 = vmatprep.subr.bf16.mxu0 %v2670_v61 }
 0x17c   : > { %2709 = vmatpush3.bf16.msk.msra.mxu1 %vm4373_vm7, %v4914_v8 }
 0x17d   : > { %2711 = vmatprep.subr.msk.bf16.mxu1 %vm4389_vm3, %v4914_v8 }
 0x17e   : > { %2673 = vmatpush3.bf16.msra.mxu0 %v2672_v45 }
 0x17f   : > { %2675 = vmatprep.subr.bf16.mxu0 %v2674_v21 }
 0x180   : > { %2713 = vmatpush3.bf16.msk.msra.mxu1 %vm5228_vm4, %v4914_v8 }
 0x181   : > { %2715 = vmatprep.subr.msk.bf16.mxu1 %vm4417_vm5, %v4914_v8 }
 0x182   : > { %2677 = vmatpush3.bf16.msra.mxu0 %v2676_v17 }
 0x183   : > { %2679 = vmatprep.subr.bf16.mxu0 %v2678_v58 }
 0x184   : > { %2717 = vmatpush3.bf16.msk.msra.mxu1 %vm5229_vm1, %v4914_v8 }
 0x185   : > { %2719 = vmatprep.subr.msk.bf16.mxu1 %vm5230_vm14, %v4914_v8 }
 0x186   : > { %2681 = vmatpush3.bf16.msra.mxu0 %v2680_v55 }
 0x187   : > { %2683 = vmatprep.subr.bf16.mxu0 %v2682_v27 }
 0x188   : > { %2721 = vmatpush3.bf16.msk.msra.mxu1 %vm4463_vm6, %v4914_v8 }
 0x189   : > { %2723 = vmatprep.subr.msk.bf16.mxu1 %vm4476_vm0, %v4914_v8 }
 0x18a   : > { %2685 = vmatpush3.bf16.msra.mxu0 %v2684_v18 }
 0x18b   : > { %2687 = vmatprep.subr.bf16.mxu0 %v2686_v0 }
 0x18c   : > { %2725 = vmatpush3.bf16.msk.msra.mxu1 %vm4495_vm9, %v4914_v8 }
 0x18d   : > { %2759 = vmatprep.subr.msk.bf16.mxu1 %vm4234_vm11, %v4914_v8 }
 0x18e   : > { %2689 = vmatpush3.bf16.msra.mxu0 %v2688_v19 }
 0x18f   : > { %1515 = vmatmul.mubr.f32.vlgmr.msra.gmra.mrb[8].mxu1 %v1130_v7  ;;  %2691 = vmatprep.subr.bf16.mxu0 %v2690_v62 }
 0x190   : > { %2761 = vmatpush3.bf16.msk.msra.mxu1 %vm4259_vm15, %v4914_v8  ;;  %1721 = vmatprep.mubr.f32.mxu1 %v4150_v49 }
 0x191   : > { %2763 = vmatprep.subr.msk.bf16.mxu1 %vm4278_vm12, %v4914_v8 }
 0x192   : > { %2693 = vmatpush3.bf16.msra.mxu0 %v2692_v9 }
 0x193   : > { %2727 = vmatprep.subr.bf16.mxu0 %v2726_v24 }
 0x194   : > { %2765 = vmatpush3.bf16.msk.msra.mxu1 %vm4301_vm8, %v4914_v8 }
 0x195   : > { %2767 = vmatprep.subr.msk.bf16.mxu1 %vm4311_vm10, %v4914_v8  ;;  %1439 = vmatmul.mubr.f32.vlgmr.msra.gmra.mrb[8].mxu0 %v4425_v40 }
 0x196   : > { %2729 = vmatpush3.bf16.msra.mxu0 %v2728_v63  ;;  %1649 = vmatprep.mubr.f32.mxu0 %v4150_v49  ;;  %v2736_v49 = vpack.c.bf16 %v5242_v34, %v5241_v28 }
 0x197   : > { %2731 = vmatprep.subr.bf16.mxu0 %v2730_v51 }
 0x198   : > { %2769 = vmatpush3.bf16.msk.msra.mxu1 %vm4336_vm13, %v4914_v8 }
 0x199   : > { %2771 = vmatprep.subr.msk.bf16.mxu1 %vm4349_vm2, %v4914_v8 }
 0x19a   : > { %2733 = vmatpush3.bf16.msra.mxu0 %v2732_v32 }
 0x19b   : > { %2735 = vmatprep.subr.bf16.mxu0 %v2734_v4 }
 0x19c   : > { %2773 = vmatpush3.bf16.msk.msra.mxu1 %vm4373_vm7, %v4914_v8 }
 0x19d   : > { %2775 = vmatprep.subr.msk.bf16.mxu1 %vm4389_vm3, %v4914_v8 }
 0x19e   : > { %2737 = vmatpush3.bf16.msra.mxu0 %v2736_v49 }
 0x19f   : > { %2739 = vmatprep.subr.bf16.mxu0 %v5243_v30 }
 0x1a0   : > { %2777 = vmatpush3.bf16.msk.msra.mxu1 %vm5228_vm4, %v4914_v8 }
 0x1a1   : > { %2779 = vmatprep.subr.msk.bf16.mxu1 %vm4417_vm5, %v4914_v8 }
 0x1a2   : > { %2741 = vmatpush3.bf16.msra.mxu0 %v5244_v35 }
 0x1a3   : > { %2743 = vmatprep.subr.bf16.mxu0 %v5245_v16 }
 0x1a4   : > { %2781 = vmatpush3.bf16.msk.msra.mxu1 %vm5229_vm1, %v4914_v8 }
 0x1a5   : > { %2783 = vmatprep.subr.msk.bf16.mxu1 %vm5230_vm14, %v4914_v8 }
 0x1a6   : > { %2745 = vmatpush3.bf16.msra.mxu0 %v5246_v26 }
 0x1a7   : > { %2747 = vmatprep.subr.bf16.mxu0 %v5247_v37 }
 0x1a8   : > { %2785 = vmatpush3.bf16.msk.msra.mxu1 %vm4463_vm6, %v4914_v8 }
 0x1a9   : > { %2787 = vmatprep.subr.msk.bf16.mxu1 %vm4476_vm0, %v4914_v8 }
 0x1aa   : > { %2749 = vmatpush3.bf16.msra.mxu0 %v5248_v53 }
 0x1ab   : > { %2751 = vmatprep.subr.bf16.mxu0 %v5249_v50 }
 0x1ac   : > { %2789 = vmatpush3.bf16.msk.msra.mxu1 %vm4495_vm9, %v4914_v8 }
 0x1ae   : > { %2753 = vmatpush3.bf16.msra.mxu0 %v5250_v29 }
 0x1af   : > { %1723 = vmatmul.mubr.f32.vlgmr.msra.gmra.mrb[10].mxu1 %v4396_v46  ;;  %2755 = vmatprep.subr.bf16.mxu0 %v5251_v20 }
 0x1b2   : > { %2757 = vmatpush3.bf16.msra.mxu0 %v5252_v1 }
 0x1b5   : > { %1651 = vmatmul.mubr.f32.vlgmr.msra.gmra.mrb[10].mxu0 %v4396_v46 }
 0x1df   : > { %v2053_v11 = vpop.f32.mrb[0].mxu1 }
 0x1e0   : > { %v2054_v57 = vpop.f32.mrb[1].mxu1 }
 0x1e1   : > { %v2055_v48 = vadd.f32 %v2054_v57, %v2053_v11 }
 0x1e7   : > { %v2018_v43 = vpop.f32.mrb[0].mxu0 }
 0x1e8   : > { %v2019_v3 = vpop.f32.mrb[1].mxu0 }
 0x1e9   : > { %v2020_v42 = vadd.f32 %v2019_v3, %v2018_v43 }
 0x1eb   : > { %v665_v2 = vadd.f32 %v2055_v48, %v2020_v42 }
 0x1ff   : > { %v2123_v8 = vpop.f32.mrb[2].mxu1 }
 0x200   : > { %v2124_v31 = vpop.f32.mrb[3].mxu1 }
 0x201   : > { %v2125_v33 = vadd.f32 %v2124_v31, %v2123_v8 }
 0x208   : > { %v2088_v40 = vpop.f32.mrb[2].mxu0 }
 0x209   : > { %v2089_v5 = vpop.f32.mrb[3].mxu0 }
 0x20a   : > { %v2090_v12 = vadd.f32 %v2089_v5, %v2088_v40 }
 0x20c   : > { %v771_v7 = vadd.f32 %v2090_v12, %v665_v2 }
 0x20e   : > { %v847_v22 = vadd.f32 %v2125_v33, %v771_v7 }
 0x222   : > { %v2193_v25 = vpop.f32.mrb[4].mxu1 }
 0x223   : > { %v2194_v39 = vpop.f32.mrb[5].mxu1 }
 0x224   : > { %v2195_v38 = vadd.f32 %v2194_v39, %v2193_v25 }
 0x228   : > { %v2158_v44 = vpop.f32.mrb[4].mxu0 }
 0x229   : > { %v2159_v46 = vpop.f32.mrb[5].mxu0 }
 0x22a   : > { %v2160_v15 = vadd.f32 %v2159_v46, %v2158_v44 }
 0x22c   : > { %v983_v59 = vadd.f32 %v2160_v15, %v847_v22 }
 0x22e   : > { %v1055_v52 = vadd.f32 %v2195_v38, %v983_v59 }
 0x242   : > { %v2263_v60 = vpop.f32.mrb[6].mxu1 }
 0x243   : > { %v2264_v61 = vpop.f32.mrb[7].mxu1 }
 0x244   : > { %v2265_v45 = vadd.f32 %v2264_v61, %v2263_v60 }
 0x248   : > { %v2228_v21 = vpop.f32.mrb[6].mxu0 }
 0x249   : > { %v2229_v17 = vpop.f32.mrb[7].mxu0 }
 0x24a   : > { %v2230_v58 = vadd.f32 %v2229_v17, %v2228_v21 }
 0x24c   : > { %v1135_v55 = vadd.f32 %v2230_v58, %v1055_v52 }
 0x24e   : > { %v1335_v27 = vadd.f32 %v2265_v45, %v1135_v55 }
 0x262   : > { %v2333_v18 = vpop.f32.mrb[8].mxu1 }
 0x263   : > { %v2334_v0 = vpop.f32.mrb[9].mxu1 }
 0x264   : > { %v2335_v19 = vadd.f32 %v2334_v0, %v2333_v18 }
 0x268   : > { %v2298_v62 = vpop.f32.mrb[8].mxu0 }
 0x269   : > { %v2299_v9 = vpop.f32.mrb[9].mxu0 }
 0x26a   : > { %v2300_v54 = vadd.f32 %v2299_v9, %v2298_v62 }
 0x26c   : > { %v1441_v10 = vadd.f32 %v2300_v54, %v1335_v27 }
 0x26e   : > { %v1517_v24 = vadd.f32 %v2335_v19, %v1441_v10 }
 0x282   : > { %v2403_v13 = vpop.f32.mrb[10].mxu1 }
 0x283   : > { %v2404_v36 = vpop.f32.mrb[11].mxu1 }
 0x284   : > { %v2405_v63 = vadd.f32 %v2404_v36, %v2403_v13 }
 0x288   : > { %v2368_v41 = vpop.f32.mrb[10].mxu0 }
 0x289   : > { %v2369_v23 = vpop.f32.mrb[11].mxu0 }
 0x28a   : > { %v2370_v51 = vadd.f32 %v2369_v23, %v2368_v41 }
 0x28c   : > { %v1653_v14 = vadd.f32 %v2370_v51, %v1517_v24 }
 0x28e   : > { %v1725_v47 = vadd.f32 %v2405_v63, %v1653_v14 }
 0x290   : > { %1728 = vst [vmem:[%s141_s24] sm:$0xff] %v1725_v47 }
 0x291 PF: > { %s12_s9 = sadd.s32 1, %s2809_s9  }
 0x292   : > { %p9_p4 = scmp.ge.s32.totalorder %s12_s9, 6  }
 0x294   :  { %11 = sbr.rel (!%p9_p4) target bundleno = 1 (0x1), region = 58 }

</bundles_post_ra>
